<compile_context>
chip_gen: v7x
topology: tpu7x:2x2x1
jax: 0.10.0
libtpu: 0.0.40
codegen_flags: <defaults>
</compile_context>

<pallas_src>
import functools
import math

import jax
import jax.numpy as jnp
from jax.experimental import pallas as pl
from jax.experimental.pallas import tpu as pltpu


def _convt_phase_kernel(x_ref, w_ref, b_ref, o_ref, *,
                        s, Tm, Qh, Qw, Cin, offs_h, offs_w, activation):
    """One batch element.

    x_ref: (1, Cin, HP, WP)        un-dilated, spatially padded input (NCHW)
    w_ref: (s*s, Cout, Tm*Tm*Cin)  per-phase im2col weights
    b_ref: (Cout, 1)
    o_ref: (1, s*s, Cout, Qh*Qw)   per-phase outputs, lane-dense minor axis
    """
    for rh in range(s):                      # s*s phases, statically unrolled
        for rw in range(s):
            ph = rh * s + rw
            ah = offs_h[rh]
            aw = offs_w[rw]
            # im2col: stack the Tm*Tm taps along the contraction axis (one concat),
            # then flatten the spatial dims onto the lane axis.
            patch = jnp.concatenate(
                [x_ref[0, :, ah + th: ah + th + Qh, aw + tw: aw + tw + Qw]
                 for th in range(Tm) for tw in range(Tm)],
                axis=0)                                       # (Tm*Tm*Cin, Qh, Qw)
            patch = patch.reshape(Tm * Tm * Cin, Qh * Qw)
            acc = jnp.dot(w_ref[ph, :, :], patch,
                          preferred_element_type=jnp.float32)  # (Cout, Qh*Qw)  MXU
            acc = acc + b_ref[...]
            if activation:
                acc = jnp.maximum(acc, 0.0)
            o_ref[0, ph, :, :] = acc.astype(o_ref.dtype)


def conv_transpose_block(x_nchw, weight, bias, *, stride, padding=None,
                         activation=True, compute_dtype=jnp.float32):
    """Forward pass of ConvTransposeBlock with its default layer stack
    (ConvTranspose2d -> ReLU): conv_transpose_2d=True, batch_norm=False, upsample=None.

    x_nchw: (N, Cin, H, W) float32
    weight: (Cin, Cout, K, K)  -- PyTorch nn.ConvTranspose2d layout
    bias:   (Cout,)
    compute_dtype: matmul operand dtype (use jnp.bfloat16 on v6e/v7x); accumulation,
                   bias add and ReLU stay in float32.
    returns (N, Cout, OH, OW) with OH = (H-1)*stride - 2*padding + K
    (output_padding=0, dilation=1, groups=1 only.)
    """
    # TODO(synk): batch_norm, Upsample and the Conv2d (conv_transpose_2d=False) branch
    #             are not exercised by the default module config and are not implemented.
    N, Cin, H, W = x_nchw.shape
    Cin_w, Cout, K, K2 = weight.shape
    assert K == K2 and Cin_w == Cin
    if padding is None:
        padding = K // 2                     # module default
    s = int(stride)
    OH = (H - 1) * s - 2 * padding + K
    OW = (W - 1) * s - 2 * padding + K
    if OH % s != 0 or OW % s != 0:
        # TODO(synk): phases with unequal output extents (OH % stride != 0) need
        #             per-phase row counts; not required for the default configs.
        raise NotImplementedError("phase decomposition requires OH % stride == 0")
    Qh, Qw = OH // s, OW // s
    Tm = -(-K // s)                          # taps per phase = ceil(K / stride)
    pad_g = K - 1 - padding                  # padding of the equivalent gather form

    # Per-phase row/col offsets into the un-dilated input, plus the small spatial pad
    # needed so every phase's window stays in bounds (zeros where ConvTranspose2d
    # would read outside the input).
    d = [-((pad_g - r) // s) for r in range(s)]          # = ceil((r - pad_g)/s)
    padL = max(0, -min(d))
    padR_h = max(0, Qh + Tm - 1 + max(d) - H)
    padR_w = max(0, Qw + Tm - 1 + max(d) - W)
    offs = tuple(di + padL for di in d)
    HP, WP = H + padL + padR_h, W + padL + padR_w

    xp = jnp.pad(x_nchw.astype(compute_dtype),
                 ((0, 0), (0, 0), (padL, padR_h), (padL, padR_w)))

    # Per-phase im2col weights: (s*s, Cout, Tm*Tm*Cin).  wf is the spatially flipped
    # kernel in HWIO layout; taps beyond K (when K % stride != 0) are zero-padded.
    wf = jnp.transpose(weight[:, :, ::-1, ::-1], (2, 3, 0, 1))    # (K, K, Cin, Cout)
    taps = [[(pad_g - r) % s + s * t for t in range(Tm)] for r in range(s)]
    zero_tap = jnp.zeros((Cout, Cin), weight.dtype)
    blocks = []
    for rh in range(s):
        for rw in range(s):
            cols = [wf[kh, kw].T if (kh < K and kw < K) else zero_tap
                    for kh in taps[rh] for kw in taps[rw]]
            blocks.append(jnp.concatenate(cols, axis=1))          # (Cout, Tm*Tm*Cin)
    w_ph = jnp.stack(blocks, axis=0).astype(compute_dtype)        # (s*s, Cout, T*T*Cin)
    b2 = bias.reshape(Cout, 1).astype(jnp.float32)

    kernel = functools.partial(_convt_phase_kernel, s=s, Tm=Tm, Qh=Qh, Qw=Qw,
                               Cin=Cin, offs_h=offs, offs_w=offs,
                               activation=activation)

    out = pl.pallas_call(
        kernel,
        out_shape=jax.ShapeDtypeStruct((N, s * s, Cout, Qh * Qw), jnp.float32),
        grid_spec=pltpu.PrefetchScalarGridSpec(
            num_scalar_prefetch=0,
            grid=(N,),
            in_specs=[
                pl.BlockSpec((1, Cin, HP, WP), lambda n: (n, 0, 0, 0)),
                pl.BlockSpec((s * s, Cout, Tm * Tm * Cin), lambda n: (0, 0, 0)),
                pl.BlockSpec((Cout, 1), lambda n: (0, 0)),
            ],
            out_specs=pl.BlockSpec((1, s * s, Cout, Qh * Qw), lambda n: (n, 0, 0, 0)),
        ),
        compiler_params=pltpu.CompilerParams(dimension_semantics=("parallel",)),
    )(xp, w_ph, b2)

    # Interleave the stride*stride phases and go back to NCHW in a single transpose.
    y = out.reshape(N, s, s, Cout, Qh, Qw)
    y = jnp.transpose(y, (0, 3, 4, 1, 5, 2)).reshape(N, Cout, OH, OW)
    return y


def _reference(x_nchw, weight, bias, *, stride, padding, activation=True):
    """Pure-JAX reference (XLA conv) mirroring nn.ConvTranspose2d + ReLU."""
    N, Cin, H, W = x_nchw.shape
    _, Cout, K, _ = weight.shape
    x = jnp.transpose(x_nchw, (0, 2, 3, 1))
    w_hwio = jnp.transpose(weight[:, :, ::-1, ::-1], (2, 3, 0, 1))
    pad = K - 1 - padding
    y = jax.lax.conv_general_dilated(
        x, w_hwio, window_strides=(1, 1),
        padding=[(pad, pad), (pad, pad)],
        lhs_dilation=(stride, stride),
        dimension_numbers=("NHWC", "HWIO", "NHWC"),
    ) + bias.reshape(1, 1, 1, Cout)
    if activation:
        y = jnp.maximum(y, 0.0)
    return jnp.transpose(y, (0, 3, 1, 2))


if __name__ == "__main__":
    # Small decoder-style config: in=4, out=8, kernel=4, stride=2, padding=1.
    N, Cin, H, W = 2, 4, 16, 16
    Cout, K, STRIDE, PADDING = 8, 4, 2, 1

    key = jax.random.PRNGKey(0)
    kx, kw, kb = jax.random.split(key, 3)
    x = jax.random.normal(kx, (N, Cin, H, W), jnp.float32)
    fan = Cin * K * K
    weight = jax.random.uniform(kw, (Cin, Cout, K, K), jnp.float32,
                                minval=-1.0, maxval=1.0) / math.sqrt(fan)
    bias = jax.random.uniform(kb, (Cout,), jnp.float32, minval=-0.1, maxval=0.1)

    y_ref = _reference(x, weight, bias, stride=STRIDE, padding=PADDING, activation=True)

    # f32 operands: tight check against the XLA reference.
    y = conv_transpose_block(x, weight, bias, stride=STRIDE, padding=PADDING,
                             activation=True, compute_dtype=jnp.float32)
    y = jax.block_until_ready(y)
    assert y.shape == (N, Cout, (H - 1) * STRIDE - 2 * PADDING + K,
                       (W - 1) * STRIDE - 2 * PADDING + K)
    assert jnp.allclose(y, y_ref, atol=1e-4, rtol=1e-4), "f32 mismatch vs reference"

    # bf16 operands (v6e/v7x MXU fast path), f32 accumulation: looser tolerance.
    y_bf16 = conv_transpose_block(x, weight, bias, stride=STRIDE, padding=PADDING,
                                  activation=True, compute_dtype=jnp.bfloat16)
    y_bf16 = jax.block_until_ready(y_bf16)
    assert jnp.allclose(y_bf16, y_ref, atol=5e-2, rtol=5e-2), "bf16 mismatch vs reference"

    print("KERNEL_OK")
</pallas_src>

<mosaic_0001>
module attributes {stable_mosaic.version = 11 : i64} {
  func.func @_convt_phase_kernel(%arg0: i32, %arg1: memref<1x4x18x18xf32, #tpu.memory_space<vmem>>, %arg2: memref<4x8x16xf32, #tpu.memory_space<vmem>>, %arg3: memref<8x1xf32, #tpu.memory_space<vmem>>, %arg4: memref<1x4x8x256xf32, #tpu.memory_space<vmem>>) attributes {dimension_semantics = [#tpu.dimension_semantics<parallel>], iteration_bounds = array<i64: 2>, scalar_prefetch = 0 : i64, scratch_operands = 0 : i64, tpu.core_type = #tpu.core_type<tc>, window_params = [{transform_indices = @transform_0, window_bounds = array<i64: 1, 4, 18, 18>}, {pipeline_mode = #tpu.pipeline_mode<synchronous>, transform_indices = @transform_1, window_bounds = array<i64: 4, 8, 16>}, {pipeline_mode = #tpu.pipeline_mode<synchronous>, transform_indices = @transform_2, window_bounds = array<i64: 8, 1>}, {transform_indices = @transform_3, window_bounds = array<i64: 1, 4, 8, 256>}]} {
    %c0 = arith.constant 0 : index
    %c0_0 = arith.constant 0 : index
    %c0_1 = arith.constant 0 : index
    %c0_2 = arith.constant 0 : index
    %0 = vector.load %arg1[%c0, %c0_0, %c0_1, %c0_2] : memref<1x4x18x18xf32, #tpu.memory_space<vmem>>, vector<1x4x16x16xf32>
    %1 = vector.shape_cast %0 : vector<1x4x16x16xf32> to vector<4x16x16xf32>
    %c0_3 = arith.constant 0 : index
    %c0_4 = arith.constant 0 : index
    %c0_5 = arith.constant 0 : index
    %c1 = arith.constant 1 : index
    %2 = vector.load %arg1[%c0_3, %c0_4, %c0_5, %c1] : memref<1x4x18x18xf32, #tpu.memory_space<vmem>>, vector<1x4x16x16xf32>
    %3 = vector.shape_cast %2 : vector<1x4x16x16xf32> to vector<4x16x16xf32>
    %c0_6 = arith.constant 0 : index
    %c0_7 = arith.constant 0 : index
    %c1_8 = arith.constant 1 : index
    %c0_9 = arith.constant 0 : index
    %4 = vector.load %arg1[%c0_6, %c0_7, %c1_8, %c0_9] : memref<1x4x18x18xf32, #tpu.memory_space<vmem>>, vector<1x4x16x16xf32>
    %5 = vector.shape_cast %4 : vector<1x4x16x16xf32> to vector<4x16x16xf32>
    %c0_10 = arith.constant 0 : index
    %c0_11 = arith.constant 0 : index
    %c1_12 = arith.constant 1 : index
    %c1_13 = arith.constant 1 : index
    %6 = vector.load %arg1[%c0_10, %c0_11, %c1_12, %c1_13] : memref<1x4x18x18xf32, #tpu.memory_space<vmem>>, vector<1x4x16x16xf32>
    %7 = vector.shape_cast %6 : vector<1x4x16x16xf32> to vector<4x16x16xf32>
    %8 = tpu.concatenate %1, %3, %5, %7 in 0 : vector<4x16x16xf32>, vector<4x16x16xf32>, vector<4x16x16xf32>, vector<4x16x16xf32> -> vector<16x16x16xf32>
    %9 = vector.shape_cast %8 : vector<16x16x16xf32> to vector<16x256xf32>
    %c0_14 = arith.constant 0 : index
    %c0_15 = arith.constant 0 : index
    %c0_16 = arith.constant 0 : index
    %10 = vector.load %arg2[%c0_14, %c0_15, %c0_16] : memref<4x8x16xf32, #tpu.memory_space<vmem>>, vector<1x8x16xf32>
    %11 = vector.shape_cast %10 : vector<1x8x16xf32> to vector<8x16xf32>
    %cst = arith.constant dense<0.000000e+00> : vector<8x256xf32>
    %12 = tpu.matmul %11, %9, %cst {dimension_numbers = #tpu.dot_dimension_numbers<[1], [0], [0], [1], [0, 0, 1, 1], [], []>} : vector<8x16xf32>, vector<16x256xf32>, vector<8x256xf32> -> vector<8x256xf32>
    %c0_17 = arith.constant 0 : index
    %c0_18 = arith.constant 0 : index
    %13 = vector.load %arg3[%c0_17, %c0_18] : memref<8x1xf32, #tpu.memory_space<vmem>>, vector<8x1xf32>
    %14 = vector.broadcast %13 : vector<8x1xf32> to vector<8x256xf32>
    %15 = arith.addf %12, %14 : vector<8x256xf32>
    %cst_19 = arith.constant 0.000000e+00 : f32
    %16 = vector.broadcast %cst_19 : f32 to vector<8x256xf32>
    %17 = arith.maximumf %15, %16 : vector<8x256xf32>
    %c0_20 = arith.constant 0 : index
    %c0_21 = arith.constant 0 : index
    %c0_22 = arith.constant 0 : index
    %c0_23 = arith.constant 0 : index
    %18 = vector.load %arg4[%c0_20, %c0_21, %c0_22, %c0_23] : memref<1x4x8x256xf32, #tpu.memory_space<vmem>>, vector<1x1x8x256xf32>
    %19 = vector.shape_cast %18 : vector<1x1x8x256xf32> to vector<8x256xf32>
    %20 = vector.shape_cast %17 : vector<8x256xf32> to vector<1x1x8x256xf32>
    tpu.vector_store %arg4[%c0_20, %c0_21, %c0_22, %c0_23], %20 {strides = array<i32>} : memref<1x4x8x256xf32, #tpu.memory_space<vmem>>, vector<1x1x8x256xf32>,
    %c0_24 = arith.constant 0 : index
    %c0_25 = arith.constant 0 : index
    %c0_26 = arith.constant 0 : index
    %c1_27 = arith.constant 1 : index
    %21 = vector.load %arg1[%c0_24, %c0_25, %c0_26, %c1_27] : memref<1x4x18x18xf32, #tpu.memory_space<vmem>>, vector<1x4x16x16xf32>
    %22 = vector.shape_cast %21 : vector<1x4x16x16xf32> to vector<4x16x16xf32>
    %c0_28 = arith.constant 0 : index
    %c0_29 = arith.constant 0 : index
    %c0_30 = arith.constant 0 : index
    %c2 = arith.constant 2 : index
    %23 = vector.load %arg1[%c0_28, %c0_29, %c0_30, %c2] : memref<1x4x18x18xf32, #tpu.memory_space<vmem>>, vector<1x4x16x16xf32>
    %24 = vector.shape_cast %23 : vector<1x4x16x16xf32> to vector<4x16x16xf32>
    %c0_31 = arith.constant 0 : index
    %c0_32 = arith.constant 0 : index
    %c1_33 = arith.constant 1 : index
    %c1_34 = arith.constant 1 : index
    %25 = vector.load %arg1[%c0_31, %c0_32, %c1_33, %c1_34] : memref<1x4x18x18xf32, #tpu.memory_space<vmem>>, vector<1x4x16x16xf32>
    %26 = vector.shape_cast %25 : vector<1x4x16x16xf32> to vector<4x16x16xf32>
    %c0_35 = arith.constant 0 : index
    %c0_36 = arith.constant 0 : index
    %c1_37 = arith.constant 1 : index
    %c2_38 = arith.constant 2 : index
    %27 = vector.load %arg1[%c0_35, %c0_36, %c1_37, %c2_38] : memref<1x4x18x18xf32, #tpu.memory_space<vmem>>, vector<1x4x16x16xf32>
    %28 = vector.shape_cast %27 : vector<1x4x16x16xf32> to vector<4x16x16xf32>
    %29 = tpu.concatenate %22, %24, %26, %28 in 0 : vector<4x16x16xf32>, vector<4x16x16xf32>, vector<4x16x16xf32>, vector<4x16x16xf32> -> vector<16x16x16xf32>
    %30 = vector.shape_cast %29 : vector<16x16x16xf32> to vector<16x256xf32>
    %c1_39 = arith.constant 1 : index
    %c0_40 = arith.constant 0 : index
    %c0_41 = arith.constant 0 : index
    %31 = vector.load %arg2[%c1_39, %c0_40, %c0_41] : memref<4x8x16xf32, #tpu.memory_space<vmem>>, vector<1x8x16xf32>
    %32 = vector.shape_cast %31 : vector<1x8x16xf32> to vector<8x16xf32>
    %cst_42 = arith.constant dense<0.000000e+00> : vector<8x256xf32>
    %33 = tpu.matmul %32, %30, %cst_42 {dimension_numbers = #tpu.dot_dimension_numbers<[1], [0], [0], [1], [0, 0, 1, 1], [], []>} : vector<8x16xf32>, vector<16x256xf32>, vector<8x256xf32> -> vector<8x256xf32>
    %c0_43 = arith.constant 0 : index
    %c0_44 = arith.constant 0 : index
    %34 = vector.load %arg3[%c0_43, %c0_44] : memref<8x1xf32, #tpu.memory_space<vmem>>, vector<8x1xf32>
    %35 = vector.broadcast %34 : vector<8x1xf32> to vector<8x256xf32>
    %36 = arith.addf %33, %35 : vector<8x256xf32>
    %cst_45 = arith.constant 0.000000e+00 : f32
    %37 = vector.broadcast %cst_45 : f32 to vector<8x256xf32>
    %38 = arith.maximumf %36, %37 : vector<8x256xf32>
    %c0_46 = arith.constant 0 : index
    %c1_47 = arith.constant 1 : index
    %c0_48 = arith.constant 0 : index
    %c0_49 = arith.constant 0 : index
    %39 = vector.load %arg4[%c0_46, %c1_47, %c0_48, %c0_49] : memref<1x4x8x256xf32, #tpu.memory_space<vmem>>, vector<1x1x8x256xf32>
    %40 = vector.shape_cast %39 : vector<1x1x8x256xf32> to vector<8x256xf32>
    %41 = vector.shape_cast %38 : vector<8x256xf32> to vector<1x1x8x256xf32>
    tpu.vector_store %arg4[%c0_46, %c1_47, %c0_48, %c0_49], %41 {strides = array<i32>} : memref<1x4x8x256xf32, #tpu.memory_space<vmem>>, vector<1x1x8x256xf32>,
    %c0_50 = arith.constant 0 : index
    %c0_51 = arith.constant 0 : index
    %c1_52 = arith.constant 1 : index
    %c0_53 = arith.constant 0 : index
    %42 = vector.load %arg1[%c0_50, %c0_51, %c1_52, %c0_53] : memref<1x4x18x18xf32, #tpu.memory_space<vmem>>, vector<1x4x16x16xf32>
    %43 = vector.shape_cast %42 : vector<1x4x16x16xf32> to vector<4x16x16xf32>
    %c0_54 = arith.constant 0 : index
    %c0_55 = arith.constant 0 : index
    %c1_56 = arith.constant 1 : index
    %c1_57 = arith.constant 1 : index
    %44 = vector.load %arg1[%c0_54, %c0_55, %c1_56, %c1_57] : memref<1x4x18x18xf32, #tpu.memory_space<vmem>>, vector<1x4x16x16xf32>
    %45 = vector.shape_cast %44 : vector<1x4x16x16xf32> to vector<4x16x16xf32>
    %c0_58 = arith.constant 0 : index
    %c0_59 = arith.constant 0 : index
    %c2_60 = arith.constant 2 : index
    %c0_61 = arith.constant 0 : index
    %46 = vector.load %arg1[%c0_58, %c0_59, %c2_60, %c0_61] : memref<1x4x18x18xf32, #tpu.memory_space<vmem>>, vector<1x4x16x16xf32>
    %47 = vector.shape_cast %46 : vector<1x4x16x16xf32> to vector<4x16x16xf32>
    %c0_62 = arith.constant 0 : index
    %c0_63 = arith.constant 0 : index
    %c2_64 = arith.constant 2 : index
    %c1_65 = arith.constant 1 : index
    %48 = vector.load %arg1[%c0_62, %c0_63, %c2_64, %c1_65] : memref<1x4x18x18xf32, #tpu.memory_space<vmem>>, vector<1x4x16x16xf32>
    %49 = vector.shape_cast %48 : vector<1x4x16x16xf32> to vector<4x16x16xf32>
    %50 = tpu.concatenate %43, %45, %47, %49 in 0 : vector<4x16x16xf32>, vector<4x16x16xf32>, vector<4x16x16xf32>, vector<4x16x16xf32> -> vector<16x16x16xf32>
    %51 = vector.shape_cast %50 : vector<16x16x16xf32> to vector<16x256xf32>
    %c2_66 = arith.constant 2 : index
    %c0_67 = arith.constant 0 : index
    %c0_68 = arith.constant 0 : index
    %52 = vector.load %arg2[%c2_66, %c0_67, %c0_68] : memref<4x8x16xf32, #tpu.memory_space<vmem>>, vector<1x8x16xf32>
    %53 = vector.shape_cast %52 : vector<1x8x16xf32> to vector<8x16xf32>
    %cst_69 = arith.constant dense<0.000000e+00> : vector<8x256xf32>
    %54 = tpu.matmul %53, %51, %cst_69 {dimension_numbers = #tpu.dot_dimension_numbers<[1], [0], [0], [1], [0, 0, 1, 1], [], []>} : vector<8x16xf32>, vector<16x256xf32>, vector<8x256xf32> -> vector<8x256xf32>
    %c0_70 = arith.constant 0 : index
    %c0_71 = arith.constant 0 : index
    %55 = vector.load %arg3[%c0_70, %c0_71] : memref<8x1xf32, #tpu.memory_space<vmem>>, vector<8x1xf32>
    %56 = vector.broadcast %55 : vector<8x1xf32> to vector<8x256xf32>
    %57 = arith.addf %54, %56 : vector<8x256xf32>
    %cst_72 = arith.constant 0.000000e+00 : f32
    %58 = vector.broadcast %cst_72 : f32 to vector<8x256xf32>
    %59 = arith.maximumf %57, %58 : vector<8x256xf32>
    %c0_73 = arith.constant 0 : index
    %c2_74 = arith.constant 2 : index
    %c0_75 = arith.constant 0 : index
    %c0_76 = arith.constant 0 : index
    %60 = vector.load %arg4[%c0_73, %c2_74, %c0_75, %c0_76] : memref<1x4x8x256xf32, #tpu.memory_space<vmem>>, vector<1x1x8x256xf32>
    %61 = vector.shape_cast %60 : vector<1x1x8x256xf32> to vector<8x256xf32>
    %62 = vector.shape_cast %59 : vector<8x256xf32> to vector<1x1x8x256xf32>
    tpu.vector_store %arg4[%c0_73, %c2_74, %c0_75, %c0_76], %62 {strides = array<i32>} : memref<1x4x8x256xf32, #tpu.memory_space<vmem>>, vector<1x1x8x256xf32>,
    %c0_77 = arith.constant 0 : index
    %c0_78 = arith.constant 0 : index
    %c1_79 = arith.constant 1 : index
    %c1_80 = arith.constant 1 : index
    %63 = vector.load %arg1[%c0_77, %c0_78, %c1_79, %c1_80] : memref<1x4x18x18xf32, #tpu.memory_space<vmem>>, vector<1x4x16x16xf32>
    %64 = vector.shape_cast %63 : vector<1x4x16x16xf32> to vector<4x16x16xf32>
    %c0_81 = arith.constant 0 : index
    %c0_82 = arith.constant 0 : index
    %c1_83 = arith.constant 1 : index
    %c2_84 = arith.constant 2 : index
    %65 = vector.load %arg1[%c0_81, %c0_82, %c1_83, %c2_84] : memref<1x4x18x18xf32, #tpu.memory_space<vmem>>, vector<1x4x16x16xf32>
    %66 = vector.shape_cast %65 : vector<1x4x16x16xf32> to vector<4x16x16xf32>
    %c0_85 = arith.constant 0 : index
    %c0_86 = arith.constant 0 : index
    %c2_87 = arith.constant 2 : index
    %c1_88 = arith.constant 1 : index
    %67 = vector.load %arg1[%c0_85, %c0_86, %c2_87, %c1_88] : memref<1x4x18x18xf32, #tpu.memory_space<vmem>>, vector<1x4x16x16xf32>
    %68 = vector.shape_cast %67 : vector<1x4x16x16xf32> to vector<4x16x16xf32>
    %c0_89 = arith.constant 0 : index
    %c0_90 = arith.constant 0 : index
    %c2_91 = arith.constant 2 : index
    %c2_92 = arith.constant 2 : index
    %69 = vector.load %arg1[%c0_89, %c0_90, %c2_91, %c2_92] : memref<1x4x18x18xf32, #tpu.memory_space<vmem>>, vector<1x4x16x16xf32>
    %70 = vector.shape_cast %69 : vector<1x4x16x16xf32> to vector<4x16x16xf32>
    %71 = tpu.concatenate %64, %66, %68, %70 in 0 : vector<4x16x16xf32>, vector<4x16x16xf32>, vector<4x16x16xf32>, vector<4x16x16xf32> -> vector<16x16x16xf32>
    %72 = vector.shape_cast %71 : vector<16x16x16xf32> to vector<16x256xf32>
    %c3 = arith.constant 3 : index
    %c0_93 = arith.constant 0 : index
    %c0_94 = arith.constant 0 : index
    %73 = vector.load %arg2[%c3, %c0_93, %c0_94] : memref<4x8x16xf32, #tpu.memory_space<vmem>>, vector<1x8x16xf32>
    %74 = vector.shape_cast %73 : vector<1x8x16xf32> to vector<8x16xf32>
    %cst_95 = arith.constant dense<0.000000e+00> : vector<8x256xf32>
    %75 = tpu.matmul %74, %72, %cst_95 {dimension_numbers = #tpu.dot_dimension_numbers<[1], [0], [0], [1], [0, 0, 1, 1], [], []>} : vector<8x16xf32>, vector<16x256xf32>, vector<8x256xf32> -> vector<8x256xf32>
    %c0_96 = arith.constant 0 : index
    %c0_97 = arith.constant 0 : index
    %76 = vector.load %arg3[%c0_96, %c0_97] : memref<8x1xf32, #tpu.memory_space<vmem>>, vector<8x1xf32>
    %77 = vector.broadcast %76 : vector<8x1xf32> to vector<8x256xf32>
    %78 = arith.addf %75, %77 : vector<8x256xf32>
    %cst_98 = arith.constant 0.000000e+00 : f32
    %79 = vector.broadcast %cst_98 : f32 to vector<8x256xf32>
    %80 = arith.maximumf %78, %79 : vector<8x256xf32>
    %c0_99 = arith.constant 0 : index
    %c3_100 = arith.constant 3 : index
    %c0_101 = arith.constant 0 : index
    %c0_102 = arith.constant 0 : index
    %81 = vector.load %arg4[%c0_99, %c3_100, %c0_101, %c0_102] : memref<1x4x8x256xf32, #tpu.memory_space<vmem>>, vector<1x1x8x256xf32>
    %82 = vector.shape_cast %81 : vector<1x1x8x256xf32> to vector<8x256xf32>
    %83 = vector.shape_cast %80 : vector<8x256xf32> to vector<1x1x8x256xf32>
    tpu.vector_store %arg4[%c0_99, %c3_100, %c0_101, %c0_102], %83 {strides = array<i32>} : memref<1x4x8x256xf32, #tpu.memory_space<vmem>>, vector<1x1x8x256xf32>,
    return
  }
  func.func @transform_0(%arg0: i32) -> (i32, i32, i32, i32) {
    %c0_i32 = arith.constant 0 : i32
    %c0_i32_0 = arith.constant 0 : i32
    %c0_i32_1 = arith.constant 0 : i32
    %c0_i32_2 = arith.constant 0 : i32
    return %arg0, %c0_i32, %c0_i32_0, %c0_i32_1 : i32, i32, i32, i32
  }
  func.func @transform_1(%arg0: i32) -> (i32, i32, i32) {
    %c0_i32 = arith.constant 0 : i32
    %c0_i32_0 = arith.constant 0 : i32
    %c0_i32_1 = arith.constant 0 : i32
    %c0_i32_2 = arith.constant 0 : i32
    return %c0_i32, %c0_i32_0, %c0_i32_1 : i32, i32, i32
  }
  func.func @transform_2(%arg0: i32) -> (i32, i32) {
    %c0_i32 = arith.constant 0 : i32
    %c0_i32_0 = arith.constant 0 : i32
    %c0_i32_1 = arith.constant 0 : i32
    return %c0_i32, %c0_i32_0 : i32, i32
  }
  func.func @transform_3(%arg0: i32) -> (i32, i32, i32, i32) {
    %c0_i32 = arith.constant 0 : i32
    %c0_i32_0 = arith.constant 0 : i32
    %c0_i32_1 = arith.constant 0 : i32
    %c0_i32_2 = arith.constant 0 : i32
    return %arg0, %c0_i32, %c0_i32_0, %c0_i32_1 : i32, i32, i32, i32
  }
}

</mosaic_0001>

<bundles_post_ra>
// kernel: tpu_custom_call.1
= control target key start
LH: loop header
LB: loop body
LE: loop exit
PB: predicated region body
PF: predicated region fallthrough
CT: control target
= control target key end

     0   :  { %8 = vsyncpa [#allocation3], 0  ;;  %s6252_s0 = inlined_call_operand.vmem [shape: f32[2,4,18,18], index: 0, kind: input, shape index: {}]   ;;  %s6253_s1 = inlined_call_operand.vmem [shape: f32[4,8,16], index: 1, kind: input, shape index: {}]   ;;  %s6254_s2 = inlined_call_operand.vmem [shape: f32[8,1], index: 2, kind: input, shape index: {}]   ;;  %s6255_s3 = inlined_call_operand.hbm [shape: f32[2,4,8,256], index: 3, kind: output, shape index: {}]  }
   0x1   :  { %10 = vsyncpa [#allocation3 + $0x1], 0  ;;  %s4256_s12 = smov 0   ;;  %s4258_s13 = smov 0  }
   0x2   :  { %s4260_s14 = smov 0   ;;  %s4262_s15 = smov 0  }
   0x3 LB: > { %s4277_s16 = sadd.s32 4294967295, %s4220_s15   ;;  %s3750_s17 = sadd.s32 4294967294, %s4220_s15   ;;  %s4220_s15 = sphi %s4262_s15, %s6672_s15   ;;  %s4216_s14 = sphi %s4260_s14, %s6671_s14   ;;  %s4212_s13 = sphi %s4258_s13, %s6670_s13   ;;  %s4208_s12 = sphi %s4256_s12, %s6669_s12  }
   0x4   : > { %s4281_s18 = sadd.s32 1, %s4220_s15   ;;  %s91_s19 = sadd.s32 1, %s4216_s14 }
   0x5   : > { %s88_s20 = ssub.s32 %s4220_s15, %s4281_s18  ;;  %p101_p0 = scmp.ne.s32.totalorder %s4216_s14, %s4212_s13 }
   0x6   : > { %p89_p1 = scmp.eq.s32.totalorder %s88_s20, 0  ;;  %p102_p2 = scmp.eq.s32.totalorder %s4277_s16, 1 }
   0x7   : > { %p107_p3 = scmp.ne.s32.totalorder %s4212_s13, %s4208_s12  ;;  %p108_p4 = scmp.eq.s32.totalorder %s3750_s17, 1 }
   0x8   : > { %s4292_s21 = scalar_select %p89_p1, %s4216_s14, %s91_s19  }
   0x9   : > { %p4294_p5 = por %p102_p2, %p101_p0  ;;  %p4298_p6 = por %p108_p4, %p107_p3 }
   0xa   : > { %p3753_p7 = scmp.ge.s32.totalorder %s4220_s15, 1  ;;  %p140_p8 = scmp.lt.s32.totalorder %s4220_s15, 3 }
   0xc   : > { %p141_p9 = pnand %p3753_p7, %p140_p8 }
   0xe   : > { %144 = sbr.rel (%p141_p9) target bundleno = 799 (0x31f), region = 32 }
  0x15   : > { %p164_p10 = scmp.lt.s32.totalorder %s4277_s16, 1  ;;  %v4222_v0 = vmov 1983009808   ;;  %v254_v2 = vlaneseq  ;;  %s4223_s29 = smov 127   ;;  %v4224_v63 = vmov 1934713408  }
  0x16   : > { %v252_v1 = vunpack.c.l.s4 %v4222_v0  ;;  %v316_v0 = vunpack.c.l.s4 %v4224_v63  ;;  %s4225_s30 = smov 16   ;;  %s4226_s4 = smov 32   ;;  %vm905_vm0 = vcmask 130048   ;;  %vm908_vm1 = vcmask 261120  }
  0x17   : > { %s165_s24 = scalar_select %p164_p10, %s4277_s16, 1  ;;  %v4306_v4 = vshrl.u32 %v254_v2, 7  ;;  %vm911_vm2 = vcmask 392192   ;;  %vm914_vm3 = vcmask 523264   ;;  %vm917_vm4 = vcmask 654336  }
  0x18   : > { %v253_v3 = vunpack.c.0.s8 %v252_v1  ;;  %s4227_s5 = smov 48   ;;  %s4228_s6 = smov 64   ;;  %vm920_vm5 = vcmask 785408   ;;  %vm923_vm6 = vcmask 916480  }
  0x19   : > { %s3791_s25 = smul.u32 96, %s165_s24  ;;  %s4229_s7 = smov 80  }
  0x1a   : > { %v4324_v10 = vsub.s32 %v253_v3, %v4306_v4  ;;  %v317_v3 = vunpack.c.0.s8 %v316_v0  ;;  %s4230_s8 = smov 96   ;;  %s4231_s9 = smov 112  }
  0x1b   : > { %s4311_s28 = scalar_lea.vmem %s6252_s0, %s3791_s25  ;;  %s4234_s17 = smov [#allocation2]  }
  0x1c   : > { %v4314_v5 = vld [vmem:[%s4311_s28 + $0x18] sm:$0xff]  ;;  %v169_v6 = vld [vmem:[%s4311_s28] sm:$0xff]  ;;  %v170_v7 = vld [vmem:[%s4311_s28 + $0x8] sm:$0xff]  ;;  %s4162_s19 = sshll.u32 %s4234_s17, 4  ;;  %s4163_s19 = int_to_ptr.vmem [resolvable:$false] %s4162_s19 }
  0x1d   : > { %197 = vrot.lane.b32.xlu1 %v4314_v5, %s4223_s29  ;;  %193 = vrot.lane.b32.xlu0 %v169_v6, %s4223_s29  ;;  %v174_v8 = vld [vmem:[%s4311_s28 + $0x38] sm:$0xff]  ;;  %v172_v9 = vld [vmem:[%s4311_s28 + $0x20] sm:$0xff]  ;;  %s4164_s20 = scalar_lea.vmem %s4163_s19, 2048 }
  0x1e   : > { %v521_v11 = vcombine.low %v170_v7, %v174_v8  ;;  %v522_v12 = vcombine.high %v170_v7, %v174_v8  ;;  %v173_v13 = vld [vmem:[%s4311_s28 + $0x30] sm:$0xff]  ;;  %v175_v14 = vld [vmem:[%s4311_s28 + $0x48] sm:$0xff]  ;;  %v4380_v38 = vld [vmem:[%s4311_s28 + $0x19] sm:$0xff] }
  0x1f   : > { %v249_v15 = vcombine.low %v169_v6, %v173_v13  ;;  %v250_v16 = vcombine.high %v169_v6, %v173_v13  ;;  %v265_v17 = vcombine.low %v4314_v5, %v175_v14  ;;  %v266_v18 = vcombine.high %v4314_v5, %v175_v14  ;;  %v4331_v19 = vld [vmem:[%s4311_s28 + $0x50] sm:$0xff]  ;;  %v4390_v41 = vld [vmem:[%s4311_s28 + $0x1] sm:$0xff]  ;;  %v4415_v48 = vld [vmem:[%s4311_s28 + $0x39] sm:$0xff] }
  0x20   : > { %v4334_v20 = vrot.slane %v521_v11, %v4324_v10  ;;  %v4337_v21 = vrot.slane %v522_v12, %v4324_v10  ;;  %v537_v22 = vcombine.low %v172_v9, %v4331_v19  ;;  %v538_v23 = vcombine.high %v172_v9, %v4331_v19  ;;  %v4383_v39 = vld [vmem:[%s4311_s28 + $0x49] sm:$0xff]  ;;  %v4393_v42 = vld [vmem:[%s4311_s28 + $0x31] sm:$0xff]  ;;  %v4418_v49 = vld [vmem:[%s4311_s28 + $0x21] sm:$0xff] }
  0x21   : > { %199 = vrot.lane.b32.xlu1 %v172_v9, %s4223_s29  ;;  %195 = vrot.lane.b32.xlu0 %v170_v7, %s4223_s29  ;;  %v4344_v24 = vrot.slane %v249_v15, %v4324_v10  ;;  %v4347_v25 = vrot.slane %v250_v16, %v4324_v10  ;;  %v4350_v26 = vrot.slane %v265_v17, %v4324_v10  ;;  %v4406_v46 = vld [vmem:[%s4311_s28 + $0x9] sm:$0xff]  ;;  %v4425_v50 = vld [vmem:[%s4311_s28 + $0x51] sm:$0xff] }
  0x22   : > { %v4353_v27 = vrot.slane %v266_v18, %v4324_v10  ;;  %v4356_v28 = vrot.slane %v537_v22, %v4324_v10  ;;  %v4359_v29 = vrot.slane %v538_v23, %v4324_v10  ;;  %v402_v40 = vcombine.high %v4380_v38, %v4383_v39  ;;  %v4449_v51 = vld [vmem:[%s4311_s28 + $0xa] sm:$0xff]  ;;  %v4456_v52 = vld [vmem:[%s4311_s28 + $0x3a] sm:$0xff]  ;;  %v4459_v53 = vld [vmem:[%s4311_s28 + $0x22] sm:$0xff] }
  0x23   : > { %v313_v30 = vcombine.low %v4344_v24, %v4350_v26  ;;  %v386_v44 = vcombine.high %v4390_v41, %v4393_v42  ;;  %6409 = vst [vmem:[#allocation5_spill] sm:$0xff] %v4449_v51  ;;  %6410 = vst [vmem:[#allocation6_spill] sm:$0xff] %v4456_v52  ;;  %v4466_v54 = vld [vmem:[%s4311_s28 + $0x52] sm:$0xff]  ;;  %v4477_v55 = vld [vmem:[%s4311_s28 + $0x2] sm:$0xff]  ;;  %v4527_v12 = vsub.s32 %v317_v3, %v4306_v4 }
  0x24   : > { %v329_v32 = vcombine.low %v4347_v25, %v4353_v27  ;;  %v330_v33 = vcombine.high %v4347_v25, %v4353_v27  ;;  %v4396_v43 = vrot.slane %v402_v40, %v4324_v10  ;;  %6411 = vst [vmem:[#allocation7_spill] sm:$0xff] %v4459_v53  ;;  %6412 = vst [vmem:[#allocation8_spill] sm:$0xff] %v4466_v54  ;;  %v4484_v56 = vld [vmem:[%s4311_s28 + $0x32] sm:$0xff]  ;;  %v4487_v57 = vld [vmem:[%s4311_s28 + $0x1a] sm:$0xff] }
  0x25   : > { %203 = vrot.lane.b32.xlu1 %v174_v8, %s4223_s29  ;;  %201 = vrot.lane.b32.xlu0 %v173_v13, %s4223_s29  ;;  %v4401_v45 = vrot.slane %v386_v44, %v4324_v10  ;;  %6413 = vst [vmem:[#allocation9_spill] sm:$0xff] %v4477_v55  ;;  %6414 = vst [vmem:[#allocation10_spill] sm:$0xff] %v4484_v56  ;;  %v4494_v58 = vld [vmem:[%s4311_s28 + $0x4a] sm:$0xff]  ;;  %v4563_v44 = vrot.slane %v313_v30, %v4527_v12 }
  0x26   : > { %6415 = vst [vmem:[#allocation11_spill] sm:$0xff] %v4487_v57  ;;  %v4549_v23 = vrot.slane %v329_v32, %v4527_v12  ;;  %v4555_v40 = vrot.slane %v330_v33, %v4527_v12 }
  0x27   : > { %6419 = vst [vmem:[#allocation15_spill] sm:$0xff] %v4563_v44 }
  0x29   : > { %1051 = vrot.lane.b32.xlu1 %v170_v7, %s4223_s29  ;;  %205 = vrot.lane.b32.xlu0 %v175_v14, %s4223_s29 }
  0x2d   : > { %1059 = vrot.lane.b32.xlu1 %v174_v8, %s4223_s29  ;;  %1055 = vrot.lane.b32.xlu0 %v172_v9, %s4223_s29 }
  0x31   : > { %1075 = vrot.lane.b32.xlu1 %v4406_v46, %s4223_s29  ;;  %1063 = vrot.lane.b32.xlu0 %v4331_v19, %s4223_s29 }
  0x35   : > { %1083 = vrot.lane.b32.xlu1 %v4415_v48, %s4223_s29  ;;  %1079 = vrot.lane.b32.xlu0 %v4418_v49, %s4223_s29 }
  0x39   : > { %1049 = vrot.lane.b32.xlu1 %v169_v6, %s4223_s29  ;;  %1087 = vrot.lane.b32.xlu0 %v4425_v50, %s4223_s29 }
  0x3d   : > { %1057 = vrot.lane.b32.xlu1 %v173_v13, %s4223_s29  ;;  %1053 = vrot.lane.b32.xlu0 %v4314_v5, %s4223_s29 }
  0x41   : > { %1073 = vrot.lane.b32.xlu1 %v4390_v41, %s4223_s29  ;;  %1061 = vrot.lane.b32.xlu0 %v175_v14, %s4223_s29 }
  0x45   : > { %1081 = vrot.lane.b32.xlu1 %v4393_v42, %s4223_s29  ;;  %1077 = vrot.lane.b32.xlu0 %v4380_v38, %s4223_s29 }
  0x49   : > { %2801 = vrot.lane.b32.xlu1 %v4406_v46, %s4223_s29  ;;  %1085 = vrot.lane.b32.xlu0 %v4383_v39, %s4223_s29 }
  0x4d   : > { %2809 = vrot.lane.b32.xlu1 %v4415_v48, %s4223_s29  ;;  %2805 = vrot.lane.b32.xlu0 %v4418_v49, %s4223_s29 }
  0x51   : > { %2825 = vrot.lane.b32.xlu1 %v4449_v51, %s4223_s29  ;;  %2813 = vrot.lane.b32.xlu0 %v4425_v50, %s4223_s29 }
  0x55   : > { %2833 = vrot.lane.b32.xlu1 %v4456_v52, %s4223_s29  ;;  %2829 = vrot.lane.b32.xlu0 %v4459_v53, %s4223_s29 }
  0x59   : > { %2799 = vrot.lane.b32.xlu1 %v4390_v41, %s4223_s29  ;;  %2837 = vrot.lane.b32.xlu0 %v4466_v54, %s4223_s29 }
  0x5d   : > { %2807 = vrot.lane.b32.xlu1 %v4393_v42, %s4223_s29  ;;  %2803 = vrot.lane.b32.xlu0 %v4380_v38, %s4223_s29 }
  0x61   : > { %2823 = vrot.lane.b32.xlu1 %v4477_v55, %s4223_s29  ;;  %2811 = vrot.lane.b32.xlu0 %v4383_v39, %s4223_s29 }
  0x65   : > { %2831 = vrot.lane.b32.xlu1 %v4484_v56, %s4223_s29  ;;  %2827 = vrot.lane.b32.xlu0 %v4487_v57, %s4223_s29 }
  0x69   : > { %207 = vrot.lane.b32.xlu1 %v4331_v19, %s4223_s29  ;;  %2835 = vrot.lane.b32.xlu0 %v4494_v58, %s4223_s29 }
  0x6d   : > { %231 = vrot.lane.b32.xlu1 %v4418_v49, %s4223_s29  ;;  %227 = vrot.lane.b32.xlu0 %v4406_v46, %s4223_s29 }
  0x71   : > { %239 = vrot.lane.b32.xlu1 %v4425_v50, %s4223_s29  ;;  %235 = vrot.lane.b32.xlu0 %v4415_v48, %s4223_s29 }
  0x75   : > { %229 = vrot.lane.b32.xlu1 %v4380_v38, %s4223_s29  ;;  %225 = vrot.lane.b32.xlu0 %v4390_v41, %s4223_s29 }
  0x79   : > { %237 = vrot.lane.b32.xlu1 %v4383_v39, %s4223_s29  ;;  %233 = vrot.lane.b32.xlu0 %v4393_v42, %s4223_s29 }
  0x8f   : > { %v198_v59 = vpop.permute.xlu1 %197  ;;  %v194_v60 = vpop.permute.xlu0 %193 }
  0x93   : > { %v4516_v61 = vpop.permute.xlu1 %199  ;;  %v4518_v62 = vpop.permute.xlu0 %195 }
  0x97   : > { %v4520_v1 = vpop.permute.xlu1 %203  ;;  %v202_v2 = vpop.permute.xlu0 %201 }
  0x98   : > { %v281_v5 = vcombine.low %v194_v60, %v202_v2  ;;  %v282_v6 = vcombine.high %v194_v60, %v202_v2 }
  0x9a   : > { %v4530_v13 = vrot.slane %v281_v5, %v4324_v10  ;;  %v296_v14 = vrot.slane %v282_v6, %v4324_v10 }
  0x9b   : > { %v4522_v7 = vpop.permute.xlu1 %1051  ;;  %v206_v8 = vpop.permute.xlu0 %205 }
  0x9c   : > { %6416 = vst [vmem:[#allocation12_spill] sm:$0xff] %v4522_v7  ;;  %v297_v9 = vcombine.low %v198_v59, %v206_v8  ;;  %v298_v11 = vcombine.high %v198_v59, %v206_v8  ;;  %1091 = vrot.lane.b32.xlu0 %v4522_v7, %s4223_s29 }
  0x9e   : > { %v4534_v15 = vrot.slane %v297_v9, %v4324_v10  ;;  %v312_v16 = vrot.slane %v298_v11, %v4324_v10 }
  0x9f   : > { %v4537_v17 = vpop.permute.xlu1 %1059  ;;  %v4539_v18 = vpop.permute.xlu0 %1055 }
  0xa0   : > { %6417 = vst [vmem:[#allocation13_spill] sm:$0xff] %v4537_v17  ;;  %6418 = vst [vmem:[#allocation14_spill] sm:$0xff] %v4539_v18  ;;  %v345_v19 = vcombine.low %v4530_v13, %v4534_v15  ;;  %v361_v22 = vcombine.low %v296_v14, %v312_v16  ;;  %v362_v4 = vcombine.high %v296_v14, %v312_v16  ;;  %1099 = vrot.lane.b32.xlu0 %v4537_v17, %s4223_s29 }
  0xa1   : > { %1095 = vrot.lane.b32.xlu1 %v4539_v18, %s4223_s29 }
  0xa2   : > { %v4566_v59 = vrot.slane %v345_v19, %v4527_v12  ;;  %v4569_v32 = vrot.slane %v361_v22, %v4527_v12  ;;  %v4572_v60 = vrot.slane %v362_v4, %v4527_v12 }
  0xa3   : > { %v4574_v25 = vpop.permute.xlu1 %1075  ;;  %v4576_v27 = vpop.permute.xlu0 %1063 }
  0xa4   : > { %6420 = vst [vmem:[#allocation16_spill] sm:$0xff] %v4566_v59  ;;  %6421 = vst [vmem:[#allocation17_spill] sm:$0xff] %v4574_v25  ;;  %1107 = vrot.lane.b32.xlu0 %v4574_v25, %s4223_s29 }
  0xa5   : > { %1103 = vrot.lane.b32.xlu1 %v4576_v27, %s4223_s29 }
  0xa7   : > { %v4590_v2 = vpop.permute.xlu1 %1083  ;;  %v4592_v3 = vpop.permute.xlu0 %1079 }
  0xa8   : > { %6422 = vst [vmem:[#allocation18_spill] sm:$0xff] %v4590_v2  ;;  %6423 = vst [vmem:[#allocation19_spill] sm:$0xff] %v4592_v3  ;;  %1115 = vrot.lane.b32.xlu0 %v4590_v2, %s4223_s29 }
  0xa9   : > { %1111 = vrot.lane.b32.xlu1 %v4592_v3, %s4223_s29 }
  0xab   : > { %v4598_v5 = vpop.permute.xlu1 %1049  ;;  %v4600_v6 = vpop.permute.xlu0 %1087 }
  0xac   : > { %6424 = vst [vmem:[#allocation20_spill] sm:$0xff] %v4598_v5  ;;  %6425 = vst [vmem:[#allocation21_spill] sm:$0xff] %v4600_v6  ;;  %1089 = vrot.lane.b32.xlu0 %v4598_v5, %s4223_s29 }
  0xad   : > { %1119 = vrot.lane.b32.xlu1 %v4600_v6, %s4223_s29 }
  0xaf   : > { %v4606_v8 = vpop.permute.xlu1 %1057  ;;  %v4608_v9 = vpop.permute.xlu0 %1053 }
  0xb0   : > { %6426 = vst [vmem:[#allocation22_spill] sm:$0xff] %v4606_v8  ;;  %6427 = vst [vmem:[#allocation23_spill] sm:$0xff] %v4608_v9  ;;  %1097 = vrot.lane.b32.xlu0 %v4606_v8, %s4223_s29  ;;  %v6452_v8 = vcombine.high %v4337_v21, %v4359_v29 }
  0xb1   : > { %1093 = vrot.lane.b32.xlu1 %v4608_v9, %s4223_s29 }
  0xb3   : > { %v4614_v11 = vpop.permute.xlu1 %1073  ;;  %v4616_v14 = vpop.permute.xlu0 %1061 }
  0xb4   : > { %6428 = vst [vmem:[#allocation24_spill] sm:$0xff] %v4614_v11  ;;  %6429 = vst [vmem:[#allocation25_spill] sm:$0xff] %v4616_v14  ;;  %1105 = vrot.lane.b32.xlu0 %v4614_v11, %s4223_s29 }
  0xb5   : > { %1101 = vrot.lane.b32.xlu1 %v4616_v14, %s4223_s29 }
  0xb7   : > { %v4622_v16 = vpop.permute.xlu1 %1081  ;;  %v4624_v19 = vpop.permute.xlu0 %1077 }
  0xb8   : > { %6430 = vst [vmem:[#allocation26_spill] sm:$0xff] %v4622_v16  ;;  %6431 = vst [vmem:[#allocation27_spill] sm:$0xff] %v4624_v19  ;;  %1113 = vrot.lane.b32.xlu0 %v4622_v16, %s4223_s29 }
  0xb9   : > { %1109 = vrot.lane.b32.xlu1 %v4624_v19, %s4223_s29  ;;  %v6449_v19 = vcombine.low %v4334_v20, %v4356_v28 }
  0xbb   : > { %v4630_v22 = vpop.permute.xlu1 %2801  ;;  %v4632_v4 = vpop.permute.xlu0 %1085 }
  0xbc   : > { %6432 = vst [vmem:[#allocation28_spill] sm:$0xff] %v4630_v22  ;;  %6433 = vst [vmem:[#allocation29_spill] sm:$0xff] %v4632_v4  ;;  %1950 = vrot.lane.b32.xlu0 %v4406_v46, %s4223_s29 }
  0xbd   : > { %1117 = vrot.lane.b32.xlu1 %v4632_v4, %s4223_s29  ;;  %v4738_v4 = vrot.slane %v6449_v19, %v4527_v12 }
  0xbf   : > { %v4638_v63 = vpop.permute.xlu1 %2809  ;;  %v4640_v36 = vpop.permute.xlu0 %2805  ;;  %6450 = vst [vmem:[#allocation45_spill] sm:$0xff] %v4738_v4 }
  0xc0   : > { %6434 = vst [vmem:[#allocation30_spill] sm:$0xff] %v4638_v63  ;;  %6435 = vst [vmem:[#allocation31_spill] sm:$0xff] %v4640_v36  ;;  %1958 = vrot.lane.b32.xlu0 %v4415_v48, %s4223_s29 }
  0xc1   : > { %1954 = vrot.lane.b32.xlu1 %v4418_v49, %s4223_s29 }
  0xc3   : > { %v4646_v31 = vpop.permute.xlu1 %2825  ;;  %v4648_v0 = vpop.permute.xlu0 %2813 }
  0xc4   : > { %6436 = vst [vmem:[#allocation32_spill] sm:$0xff] %v4646_v31  ;;  %6437 = vst [vmem:[#allocation33_spill] sm:$0xff] %v4648_v0  ;;  %1982 = vrot.lane.b32.xlu0 %v4449_v51, %s4223_s29 }
  0xc5   : > { %1962 = vrot.lane.b32.xlu1 %v4425_v50, %s4223_s29 }
  0xc7   : > { %v4654_v35 = vpop.permute.xlu1 %2833  ;;  %v4656_v33 = vpop.permute.xlu0 %2829 }
  0xc8   : > { %6438 = vst [vmem:[#allocation34_spill] sm:$0xff] %v4654_v35  ;;  %6439 = vst [vmem:[#allocation35_spill] sm:$0xff] %v4656_v33  ;;  %1990 = vrot.lane.b32.xlu0 %v4456_v52, %s4223_s29 }
  0xc9   : > { %1986 = vrot.lane.b32.xlu1 %v4459_v53, %s4223_s29 }
  0xcb   : > { %v4662_v30 = vpop.permute.xlu1 %2799  ;;  %v4664_v47 = vpop.permute.xlu0 %2837 }
  0xcc   : > { %6440 = vst [vmem:[#allocation36_spill] sm:$0xff] %v4662_v30  ;;  %6441 = vst [vmem:[#allocation37_spill] sm:$0xff] %v4664_v47  ;;  %2841 = vrot.lane.b32.xlu0 %v4630_v22, %s4223_s29 }
  0xcd   : > { %1994 = vrot.lane.b32.xlu1 %v4466_v54, %s4223_s29 }
  0xcf   : > { %v4670_v37 = vpop.permute.xlu1 %2807  ;;  %v4672_v34 = vpop.permute.xlu0 %2803 }
  0xd0   : > { %6442 = vst [vmem:[#allocation38_spill] sm:$0xff] %v4670_v37  ;;  %6443 = vst [vmem:[#allocation39_spill] sm:$0xff] %v4672_v34  ;;  %2849 = vrot.lane.b32.xlu0 %v4638_v63, %s4223_s29  ;;  %v554_v63 = vcombine.high %v4518_v62, %v4520_v1 }
  0xd1   : > { %2845 = vrot.lane.b32.xlu1 %v4640_v36, %s4223_s29  ;;  %v553_v36 = vcombine.low %v4518_v62, %v4520_v1 }
  0xd3   : > { %v4678_v53 = vpop.permute.xlu1 %2823  ;;  %v4680_v51 = vpop.permute.xlu0 %2811 }
  0xd4   : > { %6444 = vst [vmem:[#allocation40_spill] sm:$0xff] %v4678_v53  ;;  %6445 = vst [vmem:[#allocation41_spill] sm:$0xff] %v4680_v51  ;;  %2857 = vrot.lane.b32.xlu0 %v4646_v31, %s4223_s29 }
  0xd5   : > { %2853 = vrot.lane.b32.xlu1 %v4648_v0, %s4223_s29 }
  0xd7   : > { %v4686_v22 = vpop.permute.xlu1 %2831  ;;  %v4688_v54 = vpop.permute.xlu0 %2827 }
  0xd8   : > { %6446 = vst [vmem:[#allocation42_spill] sm:$0xff] %v4686_v22  ;;  %6447 = vst [vmem:[#allocation43_spill] sm:$0xff] %v4688_v54  ;;  %2865 = vrot.lane.b32.xlu0 %v4654_v35, %s4223_s29  ;;  %v4710_v35 = vrot.slane %v554_v63, %v4324_v10 }
  0xd9   : > { %2861 = vrot.lane.b32.xlu1 %v4656_v33, %s4223_s29  ;;  %v4707_v33 = vrot.slane %v553_v36, %v4324_v10 }
  0xdb   : > { %v208_v31 = vpop.permute.xlu1 %207  ;;  %v4698_v52 = vpop.permute.xlu0 %2835 }
  0xdc   : > { %6448 = vst [vmem:[#allocation44_spill] sm:$0xff] %v4698_v52  ;;  %v569_v0 = vcombine.low %v4516_v61, %v208_v31  ;;  %v570_v11 = vcombine.high %v4516_v61, %v208_v31  ;;  %1948 = vrot.lane.b32.xlu0 %v4390_v41, %s4223_s29  ;;  %v673_v31 = vcombine.low %v4418_v49, %v4425_v50 }
  0xdd   : > { %2869 = vrot.lane.b32.xlu1 %v4664_v47, %s4223_s29  ;;  %v657_v61 = vcombine.low %v4406_v46, %v4415_v48 }
  0xde   : > { %v4713_v62 = vrot.slane %v569_v0, %v4324_v10  ;;  %v4716_v1 = vrot.slane %v570_v11, %v4324_v10  ;;  %v674_v0 = vcombine.high %v4418_v49, %v4425_v50  ;;  %v658_v11 = vcombine.high %v4406_v46, %v4415_v48 }
  0xdf   : > { %v232_v16 = vpop.permute.xlu1 %231  ;;  %v228_v47 = vpop.permute.xlu0 %227  ;;  %v4747_v49 = vrot.slane %v6452_v8, %v4527_v12  ;;  %v4750_v46 = vrot.slane %v673_v31, %v4324_v10  ;;  %v4753_v48 = vrot.slane %v657_v61, %v4324_v10 }
  0xe0   : > { %v617_v36 = vcombine.low %v4707_v33, %v4713_v62  ;;  %v634_v63 = vcombine.high %v4710_v35, %v4716_v1  ;;  %1956 = vrot.lane.b32.xlu0 %v4393_v42, %s4223_s29  ;;  %v4761_v8 = vrot.slane %v674_v0, %v4324_v10  ;;  %v4764_v31 = vrot.slane %v658_v11, %v4324_v10 }
  0xe1   : > { %1952 = vrot.lane.b32.xlu1 %v4380_v38, %s4223_s29  ;;  %v721_v0 = vcombine.low %v4753_v48, %v4750_v46  ;;  %v401_v11 = vcombine.low %v4380_v38, %v4383_v39 }
  0xe2   : > { %v4741_v5 = vrot.slane %v617_v36, %v4527_v12  ;;  %v4756_v50 = vrot.slane %v634_v63, %v4527_v12 }
  0xe3   : > { %v240_v19 = vpop.permute.xlu1 %239  ;;  %v236_v25 = vpop.permute.xlu0 %235  ;;  %v409_v38 = vrot.slane %v401_v11, %v4324_v10  ;;  %v4797_v3 = vrot.slane %v721_v0, %v4527_v12  ;;  %v465_v11 = vcombine.low %v4401_v45, %v4396_v43 }
  0xe4   : > { %6451 = vst [vmem:[#allocation46_spill] sm:$0xff] %v4741_v5  ;;  %v705_v2 = vcombine.low %v232_v16, %v240_v19  ;;  %v706_v36 = vcombine.high %v232_v16, %v240_v19  ;;  %v689_v9 = vcombine.low %v228_v47, %v236_v25  ;;  %v690_v14 = vcombine.high %v228_v47, %v236_v25 }
  0xe5   : > { %1980 = vrot.lane.b32.xlu0 %v4477_v55, %s4223_s29  ;;  %1960 = vrot.lane.b32.xlu1 %v4383_v39, %s4223_s29  ;;  %v385_v19 = vcombine.low %v4390_v41, %v4393_v42  ;;  %6453 = vst [vmem:[#allocation47_spill] sm:$0xff] %v4797_v3 }
  0xe6   : > { %v713_v63 = vrot.slane %v705_v2, %v4324_v10  ;;  %v4772_v16 = vrot.slane %v706_v36, %v4324_v10  ;;  %v697_v47 = vrot.slane %v689_v9, %v4324_v10  ;;  %v4776_v25 = vrot.slane %v690_v14, %v4324_v10 }
  0xe7   : > { %v230_v61 = vpop.permute.xlu1 %229  ;;  %v226_v55 = vpop.permute.xlu0 %225  ;;  %v656_v2 = vcombine.high %v4747_v49, %v4756_v50  ;;  %v738_v9 = vcombine.high %v4764_v31, %v4761_v8  ;;  %v393_v39 = vrot.slane %v385_v19, %v4324_v10 }
  0xe8   : > { %v753_v36 = vcombine.low %v697_v47, %v713_v63  ;;  %v770_v14 = vcombine.high %v4776_v25, %v4772_v16 }
  0xe9   : > { %1988 = vrot.lane.b32.xlu0 %v4484_v56, %s4223_s29  ;;  %1984 = vrot.lane.b32.xlu1 %v4487_v57, %s4223_s29  ;;  %v4805_v57 = vrot.slane %v738_v9, %v4527_v12 }
  0xea   : > { %v4800_v56 = vrot.slane %v753_v36, %v4527_v12  ;;  %v4810_v19 = vrot.slane %v770_v14, %v4527_v12  ;;  %v449_v14 = vcombine.low %v393_v39, %v409_v38 }
  0xeb   : > { %v238_v41 = vpop.permute.xlu1 %237  ;;  %v234_v42 = vpop.permute.xlu0 %233  ;;  %6455 = vst [vmem:[#allocation49_spill] sm:$0xff] %v4805_v57 }
  0xec   : > { %6454 = vst [vmem:[#allocation48_spill] sm:$0xff] %v4800_v56  ;;  %v433_v6 = vcombine.low %v230_v61, %v238_v41  ;;  %v434_v7 = vcombine.high %v230_v61, %v238_v41  ;;  %v417_v17 = vcombine.low %v226_v55, %v234_v42  ;;  %v418_v18 = vcombine.high %v226_v55, %v234_v42 }
  0xed   : > { %2839 = vrot.lane.b32.xlu0 %v4662_v30, %s4223_s29  ;;  %1992 = vrot.lane.b32.xlu1 %v4494_v58, %s4223_s29  ;;  %v4823_v30 = vrot.slane %v465_v11, %v4527_v12  ;;  %v6457_v61 = vcombine.high %v4401_v45, %v4396_v43  ;;  %v450_v43 = vcombine.high %v393_v39, %v409_v38 }
  0xee   : > { %v441_v55 = vrot.slane %v433_v6, %v4324_v10  ;;  %v448_v0 = vrot.slane %v434_v7, %v4324_v10  ;;  %v425_v36 = vrot.slane %v417_v17, %v4324_v10  ;;  %v432_v9 = vrot.slane %v418_v18, %v4324_v10 }
  0xef   : > { %6456 = vst [vmem:[#allocation50_spill] sm:$0xff] %v4823_v30  ;;  %v4829_v6 = vrot.slane %v6457_v61, %v4527_v12  ;;  %v792_v7 = vcombine.high %v4805_v57, %v4810_v19  ;;  %v722_v17 = vcombine.high %v4753_v48, %v4750_v46  ;;  %v4846_v45 = vrot.slane %v449_v14, %v4527_v12 }
  0xf0   : > { %v497_v41 = vcombine.low %v432_v9, %v448_v0  ;;  %v498_v42 = vcombine.high %v432_v9, %v448_v0  ;;  %v481_v18 = vcombine.low %v425_v36, %v441_v55  ;;  %v754_v9 = vcombine.high %v697_v47, %v713_v63 }
  0xf1   : > { %2847 = vrot.lane.b32.xlu0 %v4670_v37, %s4223_s29  ;;  %6458 = vst [vmem:[#allocation51_spill] sm:$0xff] %v4829_v6  ;;  %2843 = vrot.lane.b32.xlu1 %v4672_v34, %s4223_s29  ;;  %v4841_v37 = vpack.i.bf16 %v792_v7, %v656_v2  ;;  %6460 = vst [vmem:[#allocation53_spill] sm:$0xff] %v4846_v45  ;;  %v618_v61 = vcombine.high %v4707_v33, %v4713_v62 }
  0xf2   : > { %v4838_v0 = vrot.slane %v497_v41, %v4527_v12  ;;  %v512_v11 = vrot.slane %v498_v42, %v4527_v12  ;;  %v482_v63 = vcombine.high %v425_v36, %v441_v55  ;;  %v4856_v47 = vrot.slane %v481_v18, %v4527_v12 }
  0xf3   : > { %6459 = vst [vmem:[#allocation52_spill] sm:$0xff] %v4841_v37  ;;  %v786_v2 = vcombine.high %v4797_v3, %v4800_v56  ;;  %v4861_v38 = vrot.slane %v722_v17, %v4527_v12  ;;  %v768_v33 = vrot.slane %v754_v9, %v4527_v12  ;;  %v6463_v62 = vcombine.high %v4549_v23, %v4569_v32 }
  0xf4   : > { %v518_v46 = vcombine.high %v4823_v30, %v4838_v0  ;;  %v519_v48 = vcombine.low %v4829_v6, %v512_v11  ;;  %6461 = vst [vmem:[#allocation54_spill] sm:$0xff] %v4856_v47  ;;  %v6465_v41 = vcombine.low %v4555_v40, %v4572_v60  ;;  %v520_v36 = vcombine.high %v4829_v6, %v512_v11 }
  0xf5   : > { %2855 = vrot.lane.b32.xlu0 %v4678_v53, %s4223_s29  ;;  %2851 = vrot.lane.b32.xlu1 %v4680_v51, %s4223_s29  ;;  %6462 = vst [vmem:[#allocation55_spill] sm:$0xff] %v4861_v38  ;;  %v346_v42 = vcombine.high %v4530_v13, %v4534_v15  ;;  %v650_v14 = vcombine.high %v4738_v4, %v4741_v5 }
  0xf6   : > { %v4867_v39 = vpack.i.bf16 %v518_v46, %v6463_v62  ;;  %v4872_v55 = vpack.i.bf16 %v519_v48, %v6465_v41  ;;  %v6467_v7 = vcombine.high %v4334_v20, %v4356_v28  ;;  %v632_v18 = vrot.slane %v618_v61, %v4527_v12 }
  0xf7   : > { %v6468_v11 = vcombine.high %v4555_v40, %v4572_v60  ;;  %v4894_v15 = vrot.slane %v450_v43, %v4527_v12  ;;  %v496_v9 = vrot.slane %v482_v63, %v4527_v12  ;;  %v3844_v46 = vpack.i.bf16 %v786_v2, %v650_v14 }
  0xf8   : > { %6464 = vst [vmem:[#allocation56_spill] sm:$0xff] %v4867_v39  ;;  %6466 = vst [vmem:[#allocation57_spill] sm:$0xff] %v4872_v55  ;;  %v600_v17 = vrot.slane %v6467_v7, %v4527_v12  ;;  %v514_v48 = vcombine.high %v4846_v45, %v4856_v47  ;;  %v737_v20 = vcombine.low %v4764_v31, %v4761_v8  ;;  %v6494_v55 = vld [vmem:[#allocation24_spill] sm:$0xff] }
  0xf9   : > { %2863 = vrot.lane.b32.xlu0 %v4686_v22, %s4223_s29  ;;  %2859 = vrot.lane.b32.xlu1 %v4688_v54, %s4223_s29  ;;  %v4891_v13 = vpack.i.bf16 %v520_v36, %v6468_v11  ;;  %6470 = vst [vmem:[#allocation59_spill] sm:$0xff] %v4894_v15  ;;  %v769_v28 = vcombine.low %v4776_v25, %v4772_v16 }
  0xfa   : > { %v787_v61 = vcombine.low %v4861_v38, %v768_v33  ;;  %v6471_v40 = vcombine.high %v4344_v24, %v4350_v26  ;;  %v360_v43 = vrot.slane %v346_v42, %v4527_v12  ;;  %v378_v63 = vcombine.high %v4563_v44, %v4566_v59 }
  0xfb   : > { %6469 = vst [vmem:[#allocation58_spill] sm:$0xff] %v4891_v13  ;;  %v633_v8 = vcombine.low %v4710_v35, %v4716_v1  ;;  %v651_v31 = vcombine.low %v600_v17, %v632_v18  ;;  %v515_v25 = vcombine.low %v4894_v15, %v496_v9  ;;  %v4918_v24 = vrot.slane %v737_v20, %v4527_v12 }
  0xfc   : > { %v328_v60 = vrot.slane %v6471_v40, %v4527_v12  ;;  %v3849_v16 = vpack.i.bf16 %v514_v48, %v378_v63  ;;  %v777_v26 = vrot.slane %v769_v28, %v4527_v12  ;;  %v788_v62 = vcombine.high %v4861_v38, %v768_v33 }
  0xfd   : > { %3845 = vrot.lane.b32.xlu0 %v3844_v46, %s4225_s30  ;;  %2867 = vrot.lane.b32.xlu1 %v4698_v52, %s4223_s29  ;;  %6472 = vst [vmem:[#allocation60_spill] sm:$0xff] %v4918_v24  ;;  %v3854_v2 = vpack.i.bf16 %v787_v61, %v651_v31  ;;  %v6473_v35 = vcombine.low %v4337_v21, %v4359_v29  ;;  %v6476_v31 = vld [vmem:[#allocation12_spill] sm:$0xff]  ;;  %s161_s29 = sand.u32 1, %s4212_s13  }
  0xfe   : > { %v379_v41 = vcombine.low %v328_v60, %v360_v43  ;;  %v641_v36 = vrot.slane %v633_v8, %v4527_v12  ;;  %v652_v42 = vcombine.high %v600_v17, %v632_v18  ;;  %v516_v7 = vcombine.high %v4894_v15, %v496_v9  ;;  %v6475_v8 = vld [vmem:[#allocation13_spill] sm:$0xff] }
  0xff   : > { %v609_v1 = vrot.slane %v6473_v35, %v4527_v12  ;;  %v789_v33 = vcombine.low %v4918_v24, %v777_v26  ;;  %v380_v46 = vcombine.high %v328_v60, %v360_v43  ;;  %v517_v48 = vcombine.low %v4823_v30, %v4838_v0 }
 0x100   : > { %v3859_v14 = vpack.i.bf16 %v515_v25, %v379_v41  ;;  %v3864_v11 = vpack.i.bf16 %v788_v62, %v652_v42  ;;  %v790_v17 = vcombine.high %v4918_v24, %v777_v26  ;;  %v381_v18 = vcombine.low %v4549_v23, %v4569_v32 }
 0x101   : > { %3850 = vrot.lane.b32.xlu0 %v3849_v16, %s4225_s30  ;;  %3855 = vrot.lane.b32.xlu1 %v3854_v2, %s4226_s4  ;;  %v653_v21 = vcombine.low %v609_v1, %v641_v36  ;;  %v3869_v29 = vpack.i.bf16 %v516_v7, %v380_v46  ;;  %v654_v9 = vcombine.high %v609_v1, %v641_v36 }
 0x102   : > { %v3879_v28 = vpack.i.bf16 %v517_v48, %v381_v18  ;;  %v791_v40 = vcombine.low %v4805_v57, %v4810_v19  ;;  %v655_v0 = vcombine.low %v4747_v49, %v4756_v50  ;;  %v6474_v19 = vld [vmem:[#allocation14_spill] sm:$0xff]  ;;  %v1425_v16 = vcombine.low %v6476_v31, %v6475_v8  ;;  %v6480_v48 = vld [vmem:[#allocation19_spill] sm:$0xff] }
 0x103   : > { %v3874_v20 = vpack.i.bf16 %v789_v33, %v653_v21  ;;  %v3884_v61 = vpack.i.bf16 %v790_v17, %v654_v9  ;;  %v1441_v63 = vcombine.low %v6474_v19, %v4576_v27  ;;  %v6481_v17 = vld [vmem:[#allocation25_spill] sm:$0xff]  ;;  %v6482_v18 = vld [vmem:[#allocation23_spill] sm:$0xff] }
 0x104   : > { %v3899_v23 = vpack.i.bf16 %v791_v40, %v655_v0  ;;  %v4969_v62 = vrot.slane %v1425_v16, %v4324_v10  ;;  %v1169_v9 = vcombine.low %v6482_v18, %v6481_v17  ;;  %v6483_v0 = vld [vmem:[#allocation18_spill] sm:$0xff] }
 0x105   : > { %3860 = vrot.lane.b32.xlu0 %v3859_v14, %s4226_s4  ;;  %3865 = vrot.lane.b32.xlu1 %v3864_v11, %s4227_s5  ;;  %v4964_v26 = vrot.slane %v1441_v63, %v4324_v10  ;;  %v6485_v16 = vld [vmem:[#allocation22_spill] sm:$0xff] }
 0x106   : > { %v5014_v44 = vrot.slane %v1169_v9, %v4324_v10 }
 0x107   : > { %v1489_v42 = vcombine.low %v4969_v62, %v4964_v26 }
 0x108   : > { %6487 = vst [vmem:[#allocation12_spill] sm:$0xff] %v5014_v44 }
 0x109   : > { %3870 = vrot.lane.b32.xlu0 %v3869_v29, %s4227_s5  ;;  %3875 = vrot.lane.b32.xlu1 %v3874_v20, %s4228_s6  ;;  %v4993_v21 = vrot.slane %v1489_v42, %v4527_v12  ;;  %v6479_v29 = vld [vmem:[#allocation21_spill] sm:$0xff] }
 0x10a   : > { %v1577_v20 = vcombine.low %v6480_v48, %v6479_v29 }
 0x10b   : > { %6478 = vst [vmem:[#allocation13_spill] sm:$0xff] %v4993_v21 }
 0x10c   : > { %v5011_v59 = vrot.slane %v1577_v20, %v4324_v10 }
 0x10d   : > { %3880 = vrot.lane.b32.xlu0 %v3879_v28, %s4228_s6  ;;  %3885 = vrot.lane.b32.xlu1 %v3884_v61, %s4229_s7 }
 0x10e   : > { %v4946_v60 = vpop.permute.xlu0 %1091 }
 0x111   : > { %3900 = vrot.lane.b32.xlu1 %v3899_v23, %s4230_s8  ;;  %v6484_v23 = vld [vmem:[#allocation17_spill] sm:$0xff] }
 0x112   : > { %v4949_v32 = vpop.permute.xlu0 %1099  ;;  %v1561_v63 = vcombine.low %v6484_v23, %v6483_v0 }
 0x113   : > { %v4951_v43 = vpop.permute.xlu1 %1095  ;;  %v1457_v25 = vcombine.low %v4946_v60, %v4949_v32 }
 0x114   : > { %v5020_v56 = vrot.slane %v1561_v63, %v4324_v10 }
 0x115   : > { %v4972_v41 = vrot.slane %v1457_v25, %v4324_v10  ;;  %v6486_v25 = vld [vmem:[#allocation20_spill] sm:$0xff] }
 0x116   : > { %v4959_v49 = vpop.permute.xlu0 %1107  ;;  %v1625_v9 = vcombine.low %v5020_v56, %v5011_v59 }
 0x117   : > { %v4961_v50 = vpop.permute.xlu1 %1103 }
 0x118   : > { %v1473_v2 = vcombine.low %v4951_v43, %v4961_v50 }
 0x11a   : > { %v4975_v35 = vrot.slane %v1473_v2, %v4324_v10  ;;  %v4977_v1 = vpop.permute.xlu0 %1115  ;;  %v1153_v2 = vcombine.low %v6486_v25, %v6485_v16 }
 0x11b   : > { %v4979_v36 = vpop.permute.xlu1 %1111  ;;  %v1593_v28 = vcombine.low %v4959_v49, %v4977_v1 }
 0x11c   : > { %v1521_v14 = vcombine.low %v4972_v41, %v4975_v35  ;;  %v5023_v6 = vrot.slane %v1153_v2, %v4324_v10 }
 0x11d   : > { %v5017_v47 = vrot.slane %v1593_v28, %v4324_v10 }
 0x11e   : > { %v4986_v7 = vrot.slane %v1521_v14, %v4527_v12  ;;  %v1090_v11 = vpop.permute.xlu0 %1089  ;;  %6488 = vst [vmem:[#allocation21_spill] sm:$0xff] %v5023_v6  ;;  %v1217_v28 = vcombine.low %v5023_v6, %v5014_v44  ;;  %v1170_v6 = vcombine.high %v6482_v18, %v6481_v17  ;;  %v1154_v17 = vcombine.high %v6486_v25, %v6485_v16  ;;  %v6502_v25 = vld [vmem:[#allocation5_spill] sm:$0xff] }
 0x11f   : > { %v4988_v33 = vpop.permute.xlu1 %1119 }
 0x120   : > { %6477 = vst [vmem:[#allocation14_spill] sm:$0xff] %v4986_v7  ;;  %v1609_v46 = vcombine.low %v4979_v36, %v4988_v33  ;;  %v6515_v7 = vld [vmem:[#allocation30_spill] sm:$0xff] }
 0x122   : > { %v1098_v61 = vpop.permute.xlu0 %1097  ;;  %v5008_v42 = vrot.slane %v1609_v46, %v4324_v10 }
 0x123   : > { %v1094_v14 = vpop.permute.xlu1 %1093  ;;  %v1185_v40 = vcombine.low %v1090_v11, %v1098_v61  ;;  %v1186_v5 = vcombine.high %v1090_v11, %v1098_v61  ;;  %v6489_v11 = vld [vmem:[#allocation29_spill] sm:$0xff]  ;;  %v6490_v61 = vld [vmem:[#allocation27_spill] sm:$0xff] }
 0x124   : > { %v1657_v46 = vcombine.low %v5017_v47, %v5008_v42  ;;  %v1305_v57 = vcombine.low %v6490_v61, %v6489_v11  ;;  %v1306_v54 = vcombine.high %v6490_v61, %v6489_v11  ;;  %v5063_v61 = vrot.slane %v1217_v28, %v4527_v12 }
 0x125   : > { %v5034_v63 = vrot.slane %v1185_v40, %v4324_v10  ;;  %v1200_v2 = vrot.slane %v1186_v5, %v4324_v10 }
 0x126   : > { %v1106_v4 = vpop.permute.xlu0 %1105  ;;  %v5046_v52 = vrot.slane %v1657_v46, %v4527_v12  ;;  %v5057_v11 = vrot.slane %v1305_v57, %v4324_v10  ;;  %v5060_v46 = vrot.slane %v1625_v9, %v4527_v12  ;;  %6498 = vst [vmem:[#allocation22_spill] sm:$0xff] %v5063_v61  ;;  %v1320_v57 = vrot.slane %v1306_v54, %v4324_v10 }
 0x127   : > { %v1102_v20 = vpop.permute.xlu1 %1101  ;;  %6491 = vst [vmem:[#allocation19_spill] sm:$0xff] %v5034_v63 }
 0x128   : > { %v1201_v30 = vcombine.low %v1094_v14, %v1102_v20  ;;  %v1202_v13 = vcombine.high %v1094_v14, %v1102_v20  ;;  %v6493_v20 = vld [vmem:[#allocation26_spill] sm:$0xff]  ;;  %6495 = vst [vmem:[#allocation23_spill] sm:$0xff] %v5046_v52  ;;  %6496 = vst [vmem:[#allocation18_spill] sm:$0xff] %v5057_v11 }
 0x129   : > { %v1289_v45 = vcombine.low %v6494_v55, %v6493_v20  ;;  %v1290_v44 = vcombine.high %v6494_v55, %v6493_v20  ;;  %6497 = vst [vmem:[#allocation17_spill] sm:$0xff] %v5060_v46  ;;  %v6517_v46 = vld [vmem:[#allocation33_spill] sm:$0xff] }
 0x12a   : > { %v5038_v15 = vrot.slane %v1201_v30, %v4324_v10  ;;  %v1216_v24 = vrot.slane %v1202_v13, %v4324_v10  ;;  %v1114_v14 = vpop.permute.xlu0 %1113 }
 0x12b   : > { %v1110_v53 = vpop.permute.xlu1 %1109  ;;  %v1322_v40 = vcombine.high %v1106_v4, %v1114_v14  ;;  %v1321_v30 = vcombine.low %v1106_v4, %v1114_v14  ;;  %v5071_v18 = vrot.slane %v1289_v45, %v4324_v10  ;;  %v1184_v4 = vrot.slane %v1170_v6, %v4324_v10  ;;  %v6501_v45 = vld [vmem:[#allocation6_spill] sm:$0xff] }
 0x12c   : > { %6492 = vst [vmem:[#allocation25_spill] sm:$0xff] %v5038_v15  ;;  %v1249_v5 = vcombine.low %v5034_v63, %v5038_v15  ;;  %v1265_v22 = vcombine.low %v1200_v2, %v1216_v24  ;;  %v1266_v13 = vcombine.high %v1200_v2, %v1216_v24  ;;  %v1304_v14 = vrot.slane %v1290_v44, %v4324_v10  ;;  %v6505_v63 = vld [vmem:[#allocation8_spill] sm:$0xff] }
 0x12d   : > { %6500 = vst [vmem:[#allocation29_spill] sm:$0xff] %v5071_v18  ;;  %v1353_v16 = vcombine.low %v5071_v18, %v5057_v11  ;;  %v5085_v54 = vrot.slane %v1321_v30, %v4324_v10  ;;  %v1336_v9 = vrot.slane %v1322_v40, %v4324_v10  ;;  %v1168_v6 = vrot.slane %v1154_v17, %v4324_v10  ;;  %v6506_v18 = vld [vmem:[#allocation7_spill] sm:$0xff] }
 0x12e   : > { %v5066_v34 = vrot.slane %v1249_v5, %v4527_v12  ;;  %v1951_v24 = vpop.permute.xlu0 %1950  ;;  %v2412_v5 = vcombine.low %v6502_v25, %v6501_v45  ;;  %v1369_v44 = vcombine.low %v1304_v14, %v1320_v57  ;;  %v1370_v28 = vcombine.high %v1304_v14, %v1320_v57 }
 0x12f   : > { %v1118_v55 = vpop.permute.xlu1 %1117  ;;  %6503 = vst [vmem:[#allocation27_spill] sm:$0xff] %v5085_v54  ;;  %v2428_v45 = vcombine.low %v6506_v18, %v6505_v63  ;;  %v1233_v11 = vcombine.low %v1168_v6, %v1184_v4 }
 0x130   : > { %6499 = vst [vmem:[#allocation20_spill] sm:$0xff] %v5066_v34  ;;  %v1337_v2 = vcombine.low %v1110_v53, %v1118_v55  ;;  %v1338_v20 = vcombine.high %v1110_v53, %v1118_v55  ;;  %v2420_v51 = vrot.slane %v2412_v5, %v4324_v10  ;;  %v1384_v5 = vrot.slane %v1370_v28, %v4527_v12 }
 0x132   : > { %v5089_v15 = vrot.slane %v1337_v2, %v4324_v10  ;;  %v1352_v53 = vrot.slane %v1338_v20, %v4324_v10  ;;  %v1959_v55 = vpop.permute.xlu0 %1958  ;;  %v1234_v2 = vcombine.high %v1168_v6, %v1184_v4  ;;  %v5099_v20 = vrot.slane %v1353_v16, %v4527_v12 }
 0x133   : > { %v1955_v61 = vpop.permute.xlu1 %1954  ;;  %v2309_v34 = vcombine.high %v1951_v24, %v1959_v55  ;;  %v2308_v63 = vcombine.low %v1951_v24, %v1959_v55  ;;  %v1377_v16 = vrot.slane %v1369_v44, %v4527_v12 }
 0x134   : > { %6504 = vst [vmem:[#allocation26_spill] sm:$0xff] %v5089_v15  ;;  %v1385_v30 = vcombine.low %v5085_v54, %v5089_v15  ;;  %v1401_v25 = vcombine.low %v1336_v9, %v1352_v53  ;;  %v1402_v40 = vcombine.high %v1336_v9, %v1352_v53  ;;  %6507 = vst [vmem:[#allocation24_spill] sm:$0xff] %v5099_v20 }
 0x135   : > { %v1273_v54 = vrot.slane %v1265_v22, %v4527_v12  ;;  %v1280_v9 = vrot.slane %v1266_v13, %v4527_v12  ;;  %v2436_v53 = vrot.slane %v2428_v45, %v4324_v10  ;;  %v1248_v24 = vrot.slane %v1234_v2, %v4527_v12 }
 0x136   : > { %v5102_v17 = vrot.slane %v1385_v30, %v4527_v12  ;;  %v1409_v57 = vrot.slane %v1401_v25, %v4527_v12  ;;  %v1416_v14 = vrot.slane %v1402_v40, %v4527_v12  ;;  %v5106_v18 = vpop.permute.xlu0 %1982  ;;  %v1241_v40 = vrot.slane %v1233_v11, %v4527_v12  ;;  %v6516_v11 = vld [vmem:[#allocation28_spill] sm:$0xff] }
 0x137   : > { %v1963_v4 = vpop.permute.xlu1 %1962  ;;  %v2316_v13 = vrot.slane %v2308_v63, %v4324_v10  ;;  %v5119_v15 = vrot.slane %v2309_v34, %v4324_v10  ;;  %v2477_v39 = vcombine.high %v2420_v51, %v2436_v53  ;;  %v3175_v37 = vcombine.low %v6516_v11, %v6515_v7  ;;  %v6518_v34 = vld [vmem:[#allocation31_spill] sm:$0xff] }
 0x138   : > { %6508 = vst [vmem:[#allocation6_spill] sm:$0xff] %v5102_v17  ;;  %v2324_v30 = vcombine.low %v1955_v61, %v1963_v4  ;;  %v2325_v25 = vcombine.high %v1955_v61, %v1963_v4  ;;  %v1424_v55 = vcombine.high %v1384_v5, %v1416_v14  ;;  %v1421_v22 = vcombine.low %v1377_v16, %v1409_v57 }
 0x139   : > { %6509 = vst [vmem:[#allocation5_spill] sm:$0xff] %v5119_v15  ;;  %v1288_v61 = vcombine.high %v1248_v24, %v1280_v9  ;;  %v1285_v2 = vcombine.low %v1241_v40, %v1273_v54  ;;  %v1422_v4 = vcombine.high %v1377_v16, %v1409_v57  ;;  %v2476_v17 = vcombine.low %v2420_v51, %v2436_v53 }
 0x13a   : > { %v2332_v28 = vrot.slane %v2324_v30, %v4324_v10  ;;  %v5123_v44 = vrot.slane %v2325_v25, %v4324_v10  ;;  %v5125_v45 = vpop.permute.xlu0 %1990  ;;  %v1286_v25 = vcombine.high %v1241_v40, %v1273_v54  ;;  %v1423_v54 = vcombine.low %v1384_v5, %v1416_v14 }
 0x13b   : > { %v5127_v6 = vpop.permute.xlu1 %1986  ;;  %v5133_v63 = vpack.i.bf16 %v1424_v55, %v1288_v61  ;;  %v5135_v30 = vpack.i.bf16 %v1421_v22, %v1285_v2  ;;  %v2444_v57 = vcombine.low %v5106_v18, %v5125_v45  ;;  %v3191_v55 = vcombine.low %v6518_v34, %v6517_v46 }
 0x13c   : > { %6510 = vst [vmem:[#allocation8_spill] sm:$0xff] %v5123_v44  ;;  %v2372_v20 = vcombine.low %v2316_v13, %v2332_v28  ;;  %v5150_v22 = vpack.i.bf16 %v1422_v4, %v1286_v25  ;;  %v2373_v51 = vcombine.high %v2316_v13, %v2332_v28  ;;  %v1287_v40 = vcombine.low %v1248_v24, %v1280_v9 }
 0x13d   : > { %6511 = vst [vmem:[#allocation7_spill] sm:$0xff] %v5133_v63  ;;  %6512 = vst [vmem:[#allocation61_spill] sm:$0xff] %v5135_v30  ;;  %v1442_v2 = vcombine.high %v6474_v19, %v4576_v27  ;;  %v2452_v30 = vrot.slane %v2444_v57, %v4324_v10  ;;  %v5165_v14 = vrot.slane %v3175_v37, %v4324_v10  ;;  %v6526_v57 = vld [vmem:[#allocation10_spill] sm:$0xff] }
 0x13e   : > { %v5138_v21 = vrot.slane %v2372_v20, %v4527_v12  ;;  %v5142_v16 = vpop.permute.xlu0 %2841  ;;  %6519 = vst [vmem:[#allocation30_spill] sm:$0xff] %v5150_v22  ;;  %v5162_v4 = vpack.i.bf16 %v1423_v54, %v1287_v40  ;;  %v5168_v5 = vrot.slane %v3191_v55, %v4324_v10  ;;  %v5171_v13 = vrot.slane %v2476_v17, %v4527_v12  ;;  %v6527_v55 = vld [vmem:[#allocation9_spill] sm:$0xff]  ;;  %v6528_v54 = vld [vmem:[#allocation11_spill] sm:$0xff] }
 0x13f   : > { %6514 = vst [vmem:[#allocation63_spill] sm:$0xff] %v5142_v16  ;;  %v5148_v61 = vpop.permute.xlu1 %1994  ;;  %v5176_v27 = vrot.slane %v2477_v39, %v4527_v12  ;;  %v5179_v19 = vrot.slane %v2373_v51, %v4527_v12  ;;  %v5184_v25 = vrot.slane %v1442_v2, %v4324_v10  ;;  %v1490_v39 = vcombine.high %v4969_v62, %v4964_v26  ;;  %v6532_v62 = vld [vmem:[#allocation34_spill] sm:$0xff] }
 0x140   : > { %6513 = vst [vmem:[#allocation62_spill] sm:$0xff] %v5138_v21  ;;  %v2460_v53 = vcombine.low %v5127_v6, %v5148_v61  ;;  %6521 = vst [vmem:[#allocation33_spill] sm:$0xff] %v5162_v4  ;;  %v1562_v2 = vcombine.high %v6484_v23, %v6483_v0  ;;  %v1578_v20 = vcombine.high %v6480_v48, %v6479_v29  ;;  %v6535_v48 = vld [vmem:[#allocation37_spill] sm:$0xff]  ;;  %v6536_v23 = vld [vmem:[#allocation35_spill] sm:$0xff] }
 0x141   : > { %6522 = vst [vmem:[#allocation31_spill] sm:$0xff] %v5171_v13  ;;  %6524 = vst [vmem:[#allocation65_spill] sm:$0xff] %v5176_v27  ;;  %v3239_v26 = vcombine.low %v5165_v14, %v5168_v5  ;;  %v2406_v0 = vcombine.low %v4861_v38, %v5179_v19  ;;  %v3327_v4 = vcombine.low %v6536_v23, %v6535_v48 }
 0x142   : > { %v2468_v63 = vrot.slane %v2460_v53, %v4324_v10  ;;  %v5160_v44 = vpop.permute.xlu0 %2849  ;;  %6525 = vst [vmem:[#allocation66_spill] sm:$0xff] %v5179_v19  ;;  %v1610_v22 = vcombine.high %v4979_v36, %v4988_v33  ;;  %v2405_v15 = vcombine.high %v4797_v3, %v5138_v21  ;;  %v1626_v36 = vcombine.high %v5020_v56, %v5011_v59 }
 0x143   : > { %6520 = vst [vmem:[#allocation28_spill] sm:$0xff] %v5160_v44  ;;  %v5173_v9 = vpop.permute.xlu1 %2845  ;;  %v1474_v33 = vcombine.high %v4951_v43, %v4961_v50  ;;  %v1594_v21 = vcombine.high %v4959_v49, %v4977_v1  ;;  %v5255_v56 = vrot.slane %v1490_v39, %v4527_v12  ;;  %v5261_v43 = vrot.slane %v3327_v4, %v4324_v10  ;;  %v6540_v4 = vld [vmem:[#allocation17_spill] sm:$0xff] }
 0x144   : > { %6523 = vst [vmem:[#allocation64_spill] sm:$0xff] %v5173_v9  ;;  %v2508_v24 = vcombine.low %v2452_v30, %v2468_v63  ;;  %v2509_v28 = vcombine.high %v2452_v30, %v2468_v63  ;;  %v3207_v30 = vcombine.low %v5142_v16, %v5160_v44  ;;  %v1658_v16 = vcombine.high %v5017_v47, %v5008_v42 }
 0x145   : > { %v1522_v42 = vcombine.high %v4972_v41, %v4975_v35  ;;  %v5266_v49 = vrot.slane %v1610_v22, %v4324_v10 }
 0x146   : > { %v5193_v51 = vrot.slane %v2508_v24, %v4527_v12  ;;  %v5196_v63 = vrot.slane %v2509_v28, %v4527_v12  ;;  %v5200_v40 = vpop.permute.xlu0 %2857  ;;  %v6533_v24 = vld [vmem:[#allocation32_spill] sm:$0xff]  ;;  %v5231_v44 = vrot.slane %v3207_v30, %v4324_v10  ;;  %v5270_v50 = vrot.slane %v1658_v16, %v4527_v12 }
 0x147   : > { %6531 = vst [vmem:[#allocation11_spill] sm:$0xff] %v5200_v40  ;;  %v3311_v53 = vcombine.low %v6533_v24, %v6532_v62  ;;  %v5210_v17 = vpop.permute.xlu1 %2853  ;;  %v5288_v16 = vrot.slane %v1594_v21, %v4324_v10  ;;  %v1536_v39 = vrot.slane %v1522_v42, %v4527_v12 }
 0x148   : > { %6529 = vst [vmem:[#allocation10_spill] sm:$0xff] %v5193_v51  ;;  %6530 = vst [vmem:[#allocation9_spill] sm:$0xff] %v5196_v63  ;;  %v3223_v37 = vcombine.low %v5173_v9, %v5210_v17  ;;  %v2542_v29 = vcombine.low %v5176_v27, %v5196_v63  ;;  %v2541_v28 = vcombine.high %v5171_v13, %v5193_v51 }
 0x149   : > { %6534 = vst [vmem:[#allocation34_spill] sm:$0xff] %v5210_v17  ;;  %v5258_v59 = vrot.slane %v3311_v53, %v4324_v10  ;;  %v1640_v53 = vrot.slane %v1626_v36, %v4527_v12  ;;  %v1673_v42 = vcombine.low %v5288_v16, %v5266_v49 }
 0x14a   : > { %v5234_v38 = vrot.slane %v3223_v37, %v4324_v10  ;;  %v5236_v19 = vpop.permute.xlu0 %2865  ;;  %v3909_v9 = vpack.i.bf16 %v2542_v29, %v2406_v0  ;;  %v3889_v47 = vpack.i.bf16 %v2541_v28, %v2405_v15  ;;  %v5249_v37 = vrot.slane %v3239_v26, %v4527_v12  ;;  %v6542_v0 = vld [vmem:[#allocation14_spill] sm:$0xff]  ;;  %v6543_v29 = vld [vmem:[#allocation13_spill] sm:$0xff] }
 0x14b   : > { %6537 = vst [vmem:[#allocation32_spill] sm:$0xff] %v5236_v19  ;;  %v5244_v51 = vpop.permute.xlu1 %2861  ;;  %v1458_v15 = vcombine.high %v4946_v60, %v4949_v32  ;;  %v3343_v35 = vcombine.low %v5200_v40, %v5236_v19  ;;  %v5282_v60 = vrot.slane %v1578_v20, %v4324_v10  ;;  %v5285_v32 = vrot.slane %v1474_v33, %v4324_v10  ;;  %v6541_v20 = vld [vmem:[#allocation52_spill] sm:$0xff] }
 0x14c   : > { %6538 = vst [vmem:[#allocation67_spill] sm:$0xff] %v5249_v37  ;;  %v3271_v30 = vcombine.low %v5231_v44, %v5234_v38  ;;  %3910 = vrot.lane.b32.xlu1 %v3909_v9, %s4226_s4  ;;  %3890 = vrot.lane.b32.xlu0 %v3889_v47, %s4225_s30  ;;  %v1690_v9 = vcombine.high %v6540_v4, %v5046_v52 }
 0x14d   : > { %v1554_v21 = vcombine.high %v6543_v29, %v6542_v0  ;;  %v5303_v33 = vrot.slane %v1562_v2, %v4324_v10  ;;  %v3375_v36 = vcombine.low %v5258_v59, %v5261_v43  ;;  %v5308_v47 = vrot.slane %v1458_v15, %v4324_v10 }
 0x14e   : > { %v5273_v41 = vrot.slane %v3271_v30, %v4527_v12  ;;  %v5277_v1 = vpop.permute.xlu0 %1948  ;;  %v6544_v30 = vld [vmem:[#allocation56_spill] sm:$0xff]  ;;  %v1691_v29 = vcombine.low %v1640_v53, %v5270_v50  ;;  %v6545_v15 = vcombine.high %v6476_v31, %v6475_v8  ;;  %v1681_v31 = vrot.slane %v1673_v42, %v4527_v12 }
 0x14f   : > { %v5290_v22 = vpop.permute.xlu1 %2869  ;;  %v3924_v0 = vpack.i.bf16 %v1690_v9, %v1554_v21  ;;  %v1641_v4 = vcombine.low %v5303_v33, %v5282_v60  ;;  %v1555_v21 = vcombine.low %v5255_v56, %v1536_v39  ;;  %v6549_v19 = vcombine.low %v6527_v55, %v6526_v57  ;;  %v4150_v57 = vld [vmem:[%s4311_s28 + $0xa] sm:$0xff]  ;;  %v4151_v55 = vld [vmem:[%s4311_s28 + $0x3a] sm:$0xff] }
 0x150   : > { %6539 = vst [vmem:[#allocation68_spill] sm:$0xff] %v5273_v41  ;;  %v3359_v28 = vcombine.low %v5244_v51, %v5290_v22  ;;  %3920 = vrot.lane.b32.xlu1 %v6541_v20, %s4231_s9  ;;  %3895 = vrot.lane.b32.xlu0 %v6544_v30, %s4229_s7  ;;  %v5315_v20 = vrot.slane %v3343_v35, %v4324_v10 }
 0x151   : > { %v5325_v52 = vrot.slane %v6545_v15, %v4324_v10  ;;  %v1537_v35 = vcombine.low %v5308_v47, %v5285_v32  ;;  %v5340_v15 = vrot.slane %v3375_v36, %v4527_v12  ;;  %v3934_v40 = vpack.i.bf16 %v1691_v29, %v1555_v21 }
 0x152   : > { %v5318_v26 = vrot.slane %v3359_v28, %v4324_v10  ;;  %v1957_v2 = vpop.permute.xlu0 %1956  ;;  %v5352_v42 = vrot.slane %v6549_v19, %v4324_v10  ;;  %v6550_v36 = vcombine.low %v6528_v54, %v4494_v58  ;;  %v1649_v29 = vrot.slane %v1641_v4, %v4527_v12  ;;  %v4152_v58 = vld [vmem:[%s4311_s28 + $0x22] sm:$0xff]  ;;  %v4153_v54 = vld [vmem:[%s4311_s28 + $0x52] sm:$0xff] }
 0x153   : > { %v1953_v30 = vpop.permute.xlu1 %1952  ;;  %v2037_v28 = vcombine.high %v5277_v1, %v1957_v2  ;;  %v1505_v8 = vcombine.low %v5325_v52, %v5184_v25  ;;  %6546 = vst [vmem:[#allocation52_spill] sm:$0xff] %v5340_v15  ;;  %v1556_v19 = vcombine.high %v5255_v56, %v1536_v39  ;;  %v2413_v48 = vcombine.high %v4150_v57, %v4151_v55 }
 0x154   : > { %v3407_v9 = vcombine.low %v5315_v20, %v5318_v26  ;;  %3925 = vrot.lane.b32.xlu1 %v3924_v0, %s4225_s30  ;;  %v1692_v0 = vcombine.high %v1640_v53, %v5270_v50  ;;  %v5358_v17 = vrot.slane %v6550_v36, %v4324_v10  ;;  %v2429_v36 = vcombine.high %v4152_v58, %v4153_v54  ;;  %v6561_v50 = vld [vmem:[#allocation12_spill] sm:$0xff] }
 0x155   : > { %v1693_v27 = vcombine.low %v1649_v29, %v1681_v31  ;;  %v2036_v4 = vcombine.low %v5277_v1, %v1957_v2  ;;  %v5373_v63 = vrot.slane %v2037_v28, %v4324_v10  ;;  %v1506_v39 = vcombine.high %v5325_v52, %v5184_v25  ;;  %v6562_v2 = vld [vmem:[#allocation21_spill] sm:$0xff] }
 0x156   : > { %v5343_v13 = vrot.slane %v3407_v9, %v4527_v12  ;;  %v1545_v9 = vrot.slane %v1537_v35, %v4527_v12  ;;  %v1513_v35 = vrot.slane %v1505_v8, %v4527_v12  ;;  %v3944_v56 = vpack.i.bf16 %v1692_v0, %v1556_v19 }
 0x157   : > { %v5345_v3 = vpop.permute.xlu0 %1980  ;;  %v1961_v23 = vpop.permute.xlu1 %1960  ;;  %6551 = vst [vmem:[#allocation70_spill] sm:$0xff] %v5373_v63  ;;  %v5395_v0 = vrot.slane %v2413_v48, %v4324_v10  ;;  %v1674_v52 = vcombine.high %v5288_v16, %v5266_v49  ;;  %v1694_v25 = vcombine.high %v1649_v29, %v1681_v31  ;;  %v1642_v48 = vcombine.high %v5303_v33, %v5282_v60  ;;  %v6556_v33 = vld [vmem:[#allocation38_spill] sm:$0xff] }
 0x158   : > { %6547 = vst [vmem:[#allocation56_spill] sm:$0xff] %v5343_v13  ;;  %6548 = vst [vmem:[#allocation69_spill] sm:$0xff] %v5345_v3  ;;  %v2052_v53 = vcombine.low %v1953_v30, %v1961_v23  ;;  %v2053_v21 = vcombine.high %v1953_v30, %v1961_v23  ;;  %3935 = vrot.lane.b32.xlu1 %v3934_v40, %s4226_s4  ;;  %v2204_v30 = vcombine.low %v5352_v42, %v5358_v17 }
 0x159   : > { %v1557_v28 = vcombine.low %v1513_v35, %v1545_v9  ;;  %v1538_v49 = vcombine.high %v5308_v47, %v5285_v32  ;;  %v1558_v31 = vcombine.high %v1513_v35, %v1545_v9  ;;  %v3376_v29 = vcombine.high %v5258_v59, %v5261_v43  ;;  %v6558_v47 = vld [vmem:[#allocation41_spill] sm:$0xff] }
 0x15a   : > { %v5376_v23 = vrot.slane %v2053_v21, %v4324_v10  ;;  %v5387_v8 = vrot.slane %v2052_v53, %v4324_v10  ;;  %v5400_v21 = vrot.slane %v2429_v36, %v4324_v10  ;;  %v5403_v53 = vrot.slane %v2036_v4, %v4324_v10  ;;  %v6557_v4 = vld [vmem:[#allocation36_spill] sm:$0xff] }
 0x15b   : > { %v5378_v40 = vpop.permute.xlu0 %1988  ;;  %v5384_v57 = vpop.permute.xlu1 %1984  ;;  %v3954_v58 = vpack.i.bf16 %v1693_v27, %v1557_v28  ;;  %v5412_v54 = vrot.slane %v2204_v30, %v4527_v12  ;;  %v5426_v60 = vrot.slane %v1506_v39, %v4527_v12  ;;  %v2903_v32 = vcombine.low %v6557_v4, %v6556_v33 }
 0x15c   : > { %6552 = vst [vmem:[#allocation71_spill] sm:$0xff] %v5376_v23  ;;  %6553 = vst [vmem:[#allocation72_spill] sm:$0xff] %v5378_v40  ;;  %3945 = vrot.lane.b32.xlu1 %v3944_v56, %s4227_s5  ;;  %v2172_v19 = vcombine.low %v5345_v3, %v5378_v40  ;;  %v2100_v36 = vcombine.low %v5403_v53, %v5387_v8  ;;  %v6559_v56 = vld [vmem:[#allocation39_spill] sm:$0xff]  ;;  %v5433_v35 = vrot.slane %v1674_v52, %v4527_v12 }
 0x15d   : > { %6555 = vst [vmem:[#allocation74_spill] sm:$0xff] %v5412_v54  ;;  %v2919_v9 = vcombine.low %v6559_v56, %v6558_v47  ;;  %v3964_v59 = vpack.i.bf16 %v1694_v25, %v1558_v31  ;;  %v3408_v43 = vcombine.high %v5315_v20, %v5318_v26  ;;  %v1218_v1 = vcombine.high %v6562_v2, %v6561_v50 }
 0x15e   : > { %v5438_v30 = vrot.slane %v2172_v19, %v4324_v10  ;;  %v5450_v52 = vrot.slane %v1538_v49, %v4527_v12  ;;  %v3272_v26 = vcombine.high %v5231_v44, %v5234_v38  ;;  %v5457_v25 = vrot.slane %v1642_v48, %v4527_v12 }
 0x15f   : > { %v5407_v55 = vpop.permute.xlu0 %2839  ;;  %v5416_v16 = vpop.permute.xlu1 %1992  ;;  %v3240_v19 = vcombine.high %v5165_v14, %v5168_v5  ;;  %v5462_v31 = vrot.slane %v2100_v36, %v4527_v12  ;;  %v3304_v2 = vcombine.high %v5249_v37, %v5273_v41  ;;  %v5470_v38 = vrot.slane %v2903_v32, %v4324_v10  ;;  %v6570_v41 = vld [vmem:[#allocation43_spill] sm:$0xff] }
 0x160   : > { %6554 = vst [vmem:[#allocation73_spill] sm:$0xff] %v5407_v55  ;;  %v2188_v27 = vcombine.low %v5384_v57, %v5416_v16  ;;  %3955 = vrot.lane.b32.xlu1 %v3954_v58, %s4228_s6  ;;  %v3440_v58 = vcombine.high %v5340_v15, %v5343_v13  ;;  %v5473_v44 = vrot.slane %v2919_v9, %v4324_v10  ;;  %v6567_v9 = vld [vmem:[#allocation42_spill] sm:$0xff]  ;;  %v6569_v15 = vld [vmem:[#allocation44_spill] sm:$0xff] }
 0x161   : > { %6564 = vst [vmem:[#allocation21_spill] sm:$0xff] %v5462_v31  ;;  %v1695_v14 = vcombine.low %v5457_v25, %v5433_v35  ;;  %v5478_v5 = vrot.slane %v3376_v29, %v4527_v12  ;;  %v5481_v48 = vrot.slane %v3408_v43, %v4527_v12  ;;  %v3055_v37 = vcombine.low %v6570_v41, %v6569_v15 }
 0x162   : > { %v5441_v28 = vrot.slane %v2188_v27, %v4324_v10  ;;  %v3969_v32 = vpack.i.bf16 %v3440_v58, %v3304_v2  ;;  %v5495_v29 = vrot.slane %v3272_v26, %v4527_v12  ;;  %v6572_v2 = vld [vmem:[#allocation53_spill] sm:$0xff]  ;;  %v2967_v40 = vcombine.low %v5470_v38, %v5473_v44 }
 0x163   : > { %v5443_v39 = vpop.permute.xlu0 %2847  ;;  %v5454_v20 = vpop.permute.xlu1 %2843  ;;  %v2133_v63 = vcombine.high %v6572_v2, %v5462_v31  ;;  %v5515_v23 = vrot.slane %v3240_v19, %v4527_v12  ;;  %v3360_v4 = vcombine.high %v5244_v51, %v5290_v22  ;;  %v6592_v22 = vld [vmem:[#allocation32_spill] sm:$0xff] }
 0x164   : > { %6560 = vst [vmem:[#allocation75_spill] sm:$0xff] %v5443_v39  ;;  %6563 = vst [vmem:[#allocation12_spill] sm:$0xff] %v5454_v20  ;;  %v2236_v50 = vcombine.low %v5438_v30, %v5441_v28  ;;  %3965 = vrot.lane.b32.xlu1 %v3964_v59, %s4229_s7  ;;  %v2935_v36 = vcombine.low %v5407_v55, %v5443_v39  ;;  %v6568_v59 = vld [vmem:[#allocation40_spill] sm:$0xff]  ;;  %v6573_v55 = vld [vmem:[#allocation18_spill] sm:$0xff] }
 0x165   : > { %v3039_v13 = vcombine.low %v6568_v59, %v6567_v9  ;;  %v6574_v39 = vld [vmem:[#allocation29_spill] sm:$0xff] }
 0x166   : > { %v5484_v49 = vrot.slane %v2236_v50, %v4527_v12  ;;  %v1559_v50 = vcombine.low %v5426_v60, %v5450_v52  ;;  %v1354_v3 = vcombine.high %v6574_v39, %v6573_v55  ;;  %v5518_v47 = vrot.slane %v2935_v36, %v4324_v10 }
 0x167   : > { %v5488_v27 = vpop.permute.xlu0 %2855  ;;  %v5497_v43 = vpop.permute.xlu1 %2851  ;;  %v5558_v39 = vrot.slane %v2967_v40, %v4527_v12  ;;  %v6579_v40 = vld [vmem:[#allocation24_spill] sm:$0xff] }
 0x168   : > { %6565 = vst [vmem:[#allocation76_spill] sm:$0xff] %v5484_v49  ;;  %6566 = vst [vmem:[#allocation77_spill] sm:$0xff] %v5488_v27  ;;  %v2951_v58 = vcombine.low %v5454_v20, %v5497_v43  ;;  %3970 = vrot.lane.b32.xlu1 %v3969_v32, %s4225_s30  ;;  %v2269_v26 = vcombine.high %v5412_v54, %v5484_v49  ;;  %v3979_v56 = vpack.i.bf16 %v1695_v14, %v1559_v50  ;;  %v6575_v14 = vld [vmem:[#allocation26_spill] sm:$0xff]  ;;  %v6576_v50 = vld [vmem:[#allocation27_spill] sm:$0xff] }
 0x169   : > { %6571 = vst [vmem:[#allocation42_spill] sm:$0xff] %v5497_v43  ;;  %v3441_v49 = vcombine.low %v5478_v5, %v5481_v48  ;;  %v1386_v19 = vcombine.high %v6576_v50, %v6575_v14  ;;  %v3305_v14 = vcombine.low %v5515_v23, %v5495_v29  ;;  %v3192_v50 = vcombine.high %v6518_v34, %v6517_v46 }
 0x16a   : > { %v5521_v32 = vrot.slane %v2951_v58, %v4324_v10  ;;  %v3904_v2 = vpack.i.bf16 %v2269_v26, %v2133_v63  ;;  %v5536_v58 = vrot.slane %v1218_v1, %v4527_v12  ;;  %v5539_v63 = vrot.slane %v3039_v13, %v4324_v10 }
 0x16b   : > { %v5531_v54 = vpop.permute.xlu1 %2859  ;;  %v5533_v36 = vpop.permute.xlu0 %2863  ;;  %v5542_v26 = vrot.slane %v3055_v37, %v4324_v10  ;;  %v2461_v1 = vcombine.high %v5127_v6, %v5148_v61  ;;  %v1696_v13 = vcombine.high %v5457_v25, %v5433_v35  ;;  %v1368_v37 = vrot.slane %v1354_v3, %v4527_v12  ;;  %v6578_v35 = vld [vmem:[#allocation6_spill] sm:$0xff] }
 0x16c   : > { %6577 = vst [vmem:[#allocation40_spill] sm:$0xff] %v5533_v36  ;;  %v2999_v55 = vcombine.low %v5518_v47, %v5521_v32  ;;  %3980 = vrot.lane.b32.xlu1 %v3979_v56, %s4230_s8  ;;  %3905 = vrot.lane.b32.xlu0 %v3904_v2, %s4225_s30  ;;  %v3071_v31 = vcombine.low %v5488_v27, %v5533_v36  ;;  %v6589_v27 = vld [vmem:[#allocation35_spill] sm:$0xff] }
 0x16d   : > { %v3989_v46 = vpack.i.bf16 %v3441_v49, %v3305_v14  ;;  %v1400_v34 = vrot.slane %v1386_v19, %v4527_v12  ;;  %v2445_v6 = vcombine.high %v5106_v18, %v5125_v45  ;;  %v1560_v3 = vcombine.high %v5426_v60, %v5450_v52  ;;  %v6580_v45 = vld [vmem:[#allocation19_spill] sm:$0xff]  ;;  %v6581_v60 = vld [vmem:[#allocation25_spill] sm:$0xff] }
 0x16e   : > { %v5561_v56 = vrot.slane %v2999_v55, %v4527_v12  ;;  %v1418_v25 = vcombine.high %v6579_v40, %v6578_v35  ;;  %v3312_v2 = vcombine.high %v6533_v24, %v6532_v62  ;;  %v3103_v55 = vcombine.low %v5539_v63, %v5542_v26  ;;  %v6583_v62 = vld [vmem:[#allocation57_spill] sm:$0xff]  ;;  %v6584_v35 = vld [vmem:[#allocation20_spill] sm:$0xff]  ;;  %v6585_v40 = vld [vmem:[#allocation22_spill] sm:$0xff] }
 0x16f   : > { %v5568_v61 = vpop.permute.xlu1 %2867  ;;  %v6582_v52 = vcombine.high %v6580_v45, %v6581_v60  ;;  %v5588_v14 = vrot.slane %v2461_v1, %v4324_v10  ;;  %v3999_v24 = vpack.i.bf16 %v1696_v13, %v1560_v3  ;;  %v1282_v49 = vcombine.high %v6585_v40, %v6584_v35  ;;  %v6586_v45 = vld [vmem:[#allocation9_spill] sm:$0xff]  ;;  %v6590_v35 = vld [vmem:[#allocation34_spill] sm:$0xff]  ;;  %v6591_v40 = vld [vmem:[#allocation64_spill] sm:$0xff] }
 0x170   : > { %v3087_v18 = vcombine.low %v5531_v54, %v5568_v61  ;;  %3990 = vrot.lane.b32.xlu1 %v3989_v46, %s4226_s4  ;;  %3915 = vrot.lane.b32.xlu0 %v6583_v62, %s4230_s8  ;;  %v5597_v46 = vrot.slane %v3071_v31, %v4324_v10  ;;  %v6587_v60 = vld [vmem:[#allocation65_spill] sm:$0xff]  ;;  %v5607_v13 = vrot.slane %v2445_v6, %v4324_v10  ;;  %v6593_v31 = vld [vmem:[#allocation11_spill] sm:$0xff]  ;;  %v6596_v6 = vld [vmem:[#allocation28_spill] sm:$0xff] }
 0x171   : > { %v1264_v19 = vrot.slane %v6582_v52, %v4527_v12  ;;  %v2543_v1 = vcombine.high %v6587_v60, %v6586_v45  ;;  %v6588_v52 = vld [vmem:[#allocation37_spill] sm:$0xff]  ;;  %v3929_v3 = vpack.i.bf16 %v1418_v25, %v1282_v49  ;;  %v1419_v62 = vcombine.low %v1368_v37, %v1400_v34  ;;  %v6594_v45 = vld [vmem:[#allocation66_spill] sm:$0xff]  ;;  %v6595_v60 = vld [vmem:[#allocation55_spill] sm:$0xff] }
 0x172   : > { %v5600_v33 = vrot.slane %v3087_v18, %v4324_v10  ;;  %v3328_v36 = vcombine.high %v6589_v27, %v6588_v52  ;;  %v3224_v51 = vcombine.high %v6591_v40, %v6590_v35  ;;  %v3344_v20 = vcombine.high %v6593_v31, %v6592_v22  ;;  %v6597_v25 = vld [vmem:[#allocation63_spill] sm:$0xff] }
 0x173   : > { %v2407_v43 = vcombine.high %v6595_v60, %v6594_v45  ;;  %v2524_v27 = vcombine.low %v5607_v13, %v5588_v14  ;;  %v3208_v49 = vcombine.high %v6597_v25, %v6596_v6  ;;  %v5623_v52 = vrot.slane %v3103_v55, %v4527_v12 }
 0x174   : > { %v3135_v18 = vcombine.low %v5597_v46, %v5600_v33  ;;  %4000 = vrot.lane.b32.xlu1 %v3999_v24, %s4231_s9  ;;  %3930 = vrot.lane.b32.xlu0 %v3929_v3, %s4225_s30  ;;  %v1283_v35 = vcombine.low %v5536_v58, %v1264_v19  ;;  %v5628_v40 = vrot.slane %v3360_v4, %v4324_v10 }
 0x175   : > { %v4009_v22 = vpack.i.bf16 %v2543_v1, %v2407_v43  ;;  %v3442_v31 = vcombine.high %v5478_v5, %v5481_v48  ;;  %v5636_v45 = vrot.slane %v3312_v2, %v4324_v10  ;;  %v5639_v55 = vrot.slane %v3328_v36, %v4324_v10 }
 0x176   : > { %v5631_v24 = vrot.slane %v3135_v18, %v4527_v12  ;;  %v3939_v60 = vpack.i.bf16 %v1419_v62, %v1283_v35  ;;  %v1420_v3 = vcombine.high %v1368_v37, %v1400_v34  ;;  %v5642_v6 = vrot.slane %v3224_v51, %v4324_v10  ;;  %v6600_v62 = vld [vmem:[#allocation5_spill] sm:$0xff]  ;;  %v6601_v51 = vld [vmem:[#allocation8_spill] sm:$0xff] }
 0x177   : > { %v5645_v4 = vrot.slane %v3344_v20, %v4324_v10  ;;  %v3306_v5 = vcombine.high %v5515_v23, %v5495_v29  ;;  %v6598_v48 = vcombine.high %v6516_v11, %v6515_v7  ;;  %v5659_v37 = vrot.slane %v3192_v50, %v4324_v10 }
 0x178   : > { %v3167_v43 = vcombine.low %v5623_v52, %v5631_v24  ;;  %4010 = vrot.lane.b32.xlu1 %v4009_v22, %s4227_s5  ;;  %v6599_v20 = vcombine.low %v5395_v0, %v5400_v21  ;;  %3940 = vrot.lane.b32.xlu0 %v3939_v60, %s4226_s4  ;;  %v1284_v2 = vcombine.high %v5536_v58, %v1264_v19  ;;  %v6603_v22 = vld [vmem:[#allocation7_spill] sm:$0xff] }
 0x179   : > { %v5656_v36 = vrot.slane %v6598_v48, %v4324_v10  ;;  %v2532_v23 = vrot.slane %v2524_v27, %v4527_v12  ;;  %v5669_v29 = vrot.slane %v3208_v49, %v4324_v10  ;;  %v3423_v7 = vcombine.low %v5645_v4, %v5628_v40  ;;  %v6605_v48 = vld [vmem:[#allocation61_spill] sm:$0xff] }
 0x17a   : > { %v2500_v34 = vrot.slane %v6599_v20, %v4527_v12  ;;  %v4019_v11 = vpack.i.bf16 %v3442_v31, %v3306_v5  ;;  %v3949_v50 = vpack.i.bf16 %v1420_v3, %v1284_v2  ;;  %v3391_v1 = vcombine.low %v5636_v45, %v5639_v55  ;;  %v6604_v31 = vld [vmem:[#allocation60_spill] sm:$0xff] }
 0x17b   : > { %v6602_v18 = vcombine.low %v6600_v62, %v6601_v51  ;;  %v3287_v58 = vcombine.low %v5669_v29, %v5642_v6  ;;  %v3255_v19 = vcombine.low %v5656_v36, %v5659_v37  ;;  %v5686_v27 = vrot.slane %v3423_v7, %v4527_v12 }
 0x17c   : > { %4020 = vrot.lane.b32.xlu1 %v4019_v11, %s4227_s5  ;;  %3950 = vrot.lane.b32.xlu0 %v3949_v50, %s4227_s5  ;;  %v2544_v49 = vcombine.low %v2500_v34, %v2532_v23  ;;  %v3399_v3 = vrot.slane %v3391_v1, %v4527_v12  ;;  %v2205_v5 = vcombine.high %v5352_v42, %v5358_v17  ;;  %v4156_v42 = vld [vmem:[%s4311_s28 + $0x1a] sm:$0xff] }
 0x17d   : > { %v2396_v25 = vrot.slane %v6602_v18, %v4527_v12  ;;  %v5689_v35 = vrot.slane %v3287_v58, %v4527_v12  ;;  %v3263_v2 = vrot.slane %v3255_v19, %v4527_v12  ;;  %v2237_v11 = vcombine.high %v5438_v30, %v5441_v28  ;;  %v4154_v18 = vld [vmem:[%s4311_s28 + $0x2] sm:$0xff]  ;;  %v4155_v58 = vld [vmem:[%s4311_s28 + $0x32] sm:$0xff] }
 0x17e   : > { %v3443_v7 = vcombine.low %v3399_v3, %v5686_v27  ;;  %v3168_v50 = vcombine.high %v5623_v52, %v5631_v24  ;;  %v2493_v1 = vcombine.high %v5395_v0, %v5400_v21  ;;  %v2141_v17 = vcombine.high %v4154_v18, %v4155_v58  ;;  %v6606_v28 = vld [vmem:[#allocation30_spill] sm:$0xff] }
 0x17f   : > { %v2408_v60 = vcombine.low %v6604_v31, %v2396_v25  ;;  %v3307_v19 = vcombine.low %v3263_v2, %v5689_v35  ;;  %v2101_v30 = vcombine.high %v5403_v53, %v5387_v8  ;;  %v3032_v0 = vcombine.high %v5558_v39, %v5561_v56 }
 0x180   : > { %4030 = vrot.lane.b32.xlu1 %v6603_v22, %s4231_s9  ;;  %3960 = vrot.lane.b32.xlu0 %v6605_v48, %s4228_s6  ;;  %v4157_v22 = vld [vmem:[%s4311_s28 + $0x4a] sm:$0xff]  ;;  %v3256_v21 = vcombine.high %v5656_v36, %v5659_v37  ;;  %v2545_v18 = vcombine.high %v2500_v34, %v2532_v23  ;;  %v5729_v58 = vrot.slane %v2237_v11, %v4527_v12 }
 0x181   : > { %v4039_v20 = vpack.i.bf16 %v2544_v49, %v2408_v60  ;;  %v2157_v48 = vcombine.high %v4156_v42, %v4157_v22  ;;  %v5714_v49 = vrot.slane %v2205_v5, %v4527_v12  ;;  %v2525_v60 = vcombine.high %v5607_v13, %v5588_v14  ;;  %v6610_v22 = vld [vmem:[#allocation42_spill] sm:$0xff] }
 0x182   : > { %v3392_v5 = vcombine.high %v5636_v45, %v5639_v55  ;;  %v3136_v8 = vcombine.high %v5597_v46, %v5600_v33  ;;  %v3984_v53 = vpack.i.bf16 %v3168_v50, %v3032_v0  ;;  %v5734_v42 = vrot.slane %v2493_v1, %v4527_v12 }
 0x183   : > { %v5737_v36 = vrot.slane %v2141_v17, %v4324_v10  ;;  %v5740_v14 = vrot.slane %v2157_v48, %v4324_v10  ;;  %v2409_v13 = vcombine.high %v6604_v31, %v2396_v25  ;;  %v2968_v45 = vcombine.high %v5470_v38, %v5473_v44  ;;  %v6611_v48 = vld [vmem:[#allocation12_spill] sm:$0xff] }
 0x184   : > { %4040 = vrot.lane.b32.xlu1 %v4039_v20, %s4228_s6  ;;  %3975 = vrot.lane.b32.xlu0 %v6606_v28, %s4229_s7  ;;  %v4049_v20 = vpack.i.bf16 %v3443_v7, %v3307_v19  ;;  %v3104_v33 = vcombine.high %v5539_v63, %v5542_v26  ;;  %v5749_v46 = vrot.slane %v2101_v30, %v4527_v12  ;;  %v6614_v28 = vld [vmem:[#allocation49_spill] sm:$0xff] }
 0x185   : > { %v3000_v55 = vcombine.high %v5518_v47, %v5521_v32  ;;  %v5755_v37 = vrot.slane %v2525_v60, %v4527_v12  ;;  %v3424_v34 = vcombine.high %v5645_v4, %v5628_v40  ;;  %v4059_v23 = vpack.i.bf16 %v2545_v18, %v2409_v13  ;;  %v6620_v18 = vld [vmem:[#allocation69_spill] sm:$0xff] }
 0x186   : > { %v3444_v38 = vcombine.high %v3399_v3, %v5686_v27  ;;  %v5761_v44 = vrot.slane %v3136_v8, %v4527_v12  ;;  %v2270_v63 = vcombine.low %v5714_v49, %v5729_v58  ;;  %v5766_v26 = vrot.slane %v3256_v21, %v4527_v12  ;;  %v6608_v3 = vld [vmem:[#allocation33_spill] sm:$0xff] }
 0x187   : > { %v5769_v47 = vrot.slane %v3392_v5, %v4527_v12  ;;  %v3040_v32 = vcombine.high %v6568_v59, %v6567_v9  ;;  %v6607_v40 = vcombine.high %v6600_v62, %v6601_v51  ;;  %v3288_v25 = vcombine.high %v5669_v29, %v5642_v6  ;;  %v6609_v9 = vld [vmem:[#allocation59_spill] sm:$0xff]  ;;  %v6622_v13 = vld [vmem:[#allocation73_spill] sm:$0xff] }
 0x188   : > { %4050 = vrot.lane.b32.xlu1 %v4049_v20, %s4228_s6  ;;  %3985 = vrot.lane.b32.xlu0 %v3984_v53, %s4225_s30  ;;  %v3308_v27 = vcombine.high %v3263_v2, %v5689_v35  ;;  %v5782_v31 = vrot.slane %v3000_v55, %v4527_v12  ;;  %v2134_v59 = vcombine.low %v6609_v9, %v5749_v46  ;;  %v6619_v20 = vld [vmem:[#allocation72_spill] sm:$0xff]  ;;  %v6621_v53 = vld [vmem:[#allocation75_spill] sm:$0xff] }
 0x189   : > { %v2403_v4 = vrot.slane %v6607_v40, %v4527_v12  ;;  %v5789_v7 = vrot.slane %v2968_v45, %v4527_v12  ;;  %v5792_v62 = vrot.slane %v3104_v33, %v4527_v12  ;;  %v5795_v6 = vrot.slane %v3424_v34, %v4527_v12 }
 0x18a   : > { %v3088_v29 = vcombine.high %v5531_v54, %v5568_v61  ;;  %v4069_v51 = vpack.i.bf16 %v3444_v38, %v3308_v27  ;;  %v2546_v35 = vcombine.low %v5734_v42, %v5755_v37  ;;  %v3056_v2 = vcombine.high %v6570_v41, %v6569_v15  ;;  %v6612_v54 = vld [vmem:[#allocation40_spill] sm:$0xff]  ;;  %v6613_v61 = vld [vmem:[#allocation77_spill] sm:$0xff]  ;;  %v6615_v41 = vld [vmem:[#allocation38_spill] sm:$0xff] }
 0x18b   : > { %v2189_v11 = vcombine.high %v5384_v57, %v5416_v16  ;;  %v4004_v50 = vpack.i.bf16 %v2270_v63, %v2134_v59  ;;  %v3169_v1 = vcombine.low %v5792_v62, %v5761_v44  ;;  %v3302_v17 = vrot.slane %v3288_v25, %v4527_v12  ;;  %v6616_v15 = vld [vmem:[#allocation36_spill] sm:$0xff]  ;;  %v6617_v57 = vld [vmem:[#allocation41_spill] sm:$0xff]  ;;  %v6618_v16 = vld [vmem:[#allocation39_spill] sm:$0xff] }
 0x18c   : > { %4060 = vrot.lane.b32.xlu1 %v4059_v23, %s4229_s7  ;;  %3995 = vrot.lane.b32.xlu0 %v6608_v3, %s4230_s8  ;;  %v2952_v19 = vcombine.high %v6611_v48, %v6610_v22  ;;  %v3072_v30 = vcombine.high %v6613_v61, %v6612_v54  ;;  %v2410_v0 = vcombine.low %v6614_v28, %v2403_v4 }
 0x18d   : > { %v2904_v21 = vcombine.high %v6616_v15, %v6615_v41  ;;  %v2920_v60 = vcombine.high %v6618_v16, %v6617_v57  ;;  %v2173_v5 = vcombine.high %v6620_v18, %v6619_v20  ;;  %v3033_v8 = vcombine.low %v5789_v7, %v5782_v31  ;;  %v6624_v57 = vld [vmem:[#allocation70_spill] sm:$0xff]  ;;  %v6625_v16 = vld [vmem:[#allocation71_spill] sm:$0xff] }
 0x18e   : > { %v2936_v45 = vcombine.high %v6622_v13, %v6621_v53  ;;  %v3102_v33 = vrot.slane %v3088_v29, %v4324_v10  ;;  %v4079_v55 = vpack.i.bf16 %v2546_v35, %v2410_v0  ;;  %v3445_v34 = vcombine.low %v5769_v47, %v5795_v6 }
 0x18f   : > { %v3054_v23 = vrot.slane %v3040_v32, %v4324_v10  ;;  %v5830_v38 = vrot.slane %v2189_v11, %v4324_v10  ;;  %v4014_v63 = vpack.i.bf16 %v3169_v1, %v3033_v8  ;;  %v3070_v40 = vrot.slane %v3056_v2, %v4324_v10 }
 0x190   : > { %4070 = vrot.lane.b32.xlu1 %v4069_v51, %s4229_s7  ;;  %4005 = vrot.lane.b32.xlu0 %v4004_v50, %s4226_s4  ;;  %v2966_v25 = vrot.slane %v2952_v19, %v4324_v10  ;;  %v3086_v27 = vrot.slane %v3072_v30, %v4324_v10  ;;  %v3309_v3 = vcombine.low %v5766_v26, %v3302_v17 }
 0x191   : > { %v2918_v59 = vrot.slane %v2904_v21, %v4324_v10  ;;  %v2934_v29 = vrot.slane %v2920_v60, %v4324_v10  ;;  %v2220_v32 = vcombine.low %v5737_v36, %v5740_v14  ;;  %v5842_v51 = vrot.slane %v2173_v5, %v4324_v10 }
 0x192   : > { %v2950_v35 = vrot.slane %v2936_v45, %v4324_v10  ;;  %v3152_v2 = vcombine.high %v3086_v27, %v3102_v33  ;;  %v4089_v11 = vpack.i.bf16 %v3445_v34, %v3309_v3  ;;  %v2547_v50 = vcombine.high %v5734_v42, %v5755_v37  ;;  %v6623_v10 = vld [vmem:[#allocation58_spill] sm:$0xff]  ;;  %v5888_v34 = vpop.permute.xlu0 %3845 }
 0x193   : > { %v2252_v1 = vcombine.low %v5842_v51, %v5830_v38  ;;  %v2271_v22 = vcombine.high %v5714_v49, %v5729_v58  ;;  %v3120_v48 = vcombine.high %v3054_v23, %v3070_v40  ;;  %v2411_v54 = vcombine.high %v6614_v28, %v2403_v4  ;;  %v6627_v45 = vld [vmem:[#allocation50_spill] sm:$0xff] }
 0x194   : > { %4080 = vrot.lane.b32.xlu1 %v4079_v55, %s4230_s8  ;;  %4015 = vrot.lane.b32.xlu0 %v4014_v63, %s4226_s4  ;;  %v3016_v19 = vcombine.high %v2950_v35, %v2966_v25  ;;  %v2228_v61 = vrot.slane %v2220_v32, %v4527_v12  ;;  %v2135_v42 = vcombine.high %v6609_v9, %v5749_v46  ;;  %s3754_s4 = sshll.u32 %s161_s29, 6 }
 0x195   : > { %v2984_v37 = vcombine.high %v2918_v59, %v2934_v29  ;;  %v5860_v30 = vrot.slane %v3152_v2, %v4527_v12  ;;  %v4099_v0 = vpack.i.bf16 %v2547_v50, %v2411_v54  ;;  %v3446_v49 = vcombine.high %v5769_v47, %v5795_v6 }
 0x196   : > { %v2260_v58 = vrot.slane %v2252_v1, %v4527_v12  ;;  %v3151_v41 = vcombine.low %v3086_v27, %v3102_v33  ;;  %v4034_v4 = vpack.i.bf16 %v2271_v22, %v2135_v42  ;;  %v3170_v28 = vcombine.high %v5792_v62, %v5761_v44 }
 0x197   : > { %v3030_v15 = vrot.slane %v3016_v19, %v4527_v12  ;;  %v3310_v46 = vcombine.high %v5766_v26, %v3302_v17  ;;  %v3134_v9 = vrot.slane %v3120_v48, %v4527_v12  ;;  %v3119_v21 = vcombine.low %v3054_v23, %v3070_v40 }
 0x198   : > { %4090 = vrot.lane.b32.xlu1 %v4089_v11, %s4230_s8  ;;  %4025 = vrot.lane.b32.xlu0 %v6623_v10, %s4231_s9  ;;  %v6626_v47 = vcombine.low %v6624_v57, %v6625_v16  ;;  %v3015_v60 = vcombine.low %v2950_v35, %v2966_v25  ;;  %v3034_v44 = vcombine.high %v5789_v7, %v5782_v31  ;;  %v5886_v7 = vpop.permute.xlu1 %3855  ;;  %v5899_v35 = vpop.permute.xlu0 %3850 }
 0x199   : > { %v4109_v62 = vpack.i.bf16 %v3446_v49, %v3310_v46  ;;  %v2998_v20 = vrot.slane %v2984_v37, %v4527_v12  ;;  %v3174_v18 = vcombine.high %v3134_v9, %v5860_v30  ;;  %v2983_v26 = vcombine.low %v2918_v59, %v2934_v29 }
 0x19a   : > { %v2124_v6 = vrot.slane %v6626_v47, %v4527_v12  ;;  %v3159_v17 = vrot.slane %v3151_v41, %v4527_v12  ;;  %v4044_v5 = vpack.i.bf16 %v3170_v28, %v3034_v44  ;;  %v2272_v8 = vcombine.low %v2228_v61, %v2260_v58  ;;  %v1839_v28 = vld [vmem:[%s6254_s2] sm:$0xff] }
 0x19b   : > { %v3038_v53 = vcombine.high %v2998_v20, %v3030_v15  ;;  %v3023_v13 = vrot.slane %v3015_v60, %v4527_v12  ;;  %v3127_v31 = vrot.slane %v3119_v21, %v4527_v12  ;;  %v2991_v63 = vrot.slane %v2983_v26, %v4527_v12 }
 0x19c   : > { %4100 = vrot.lane.b32.xlu1 %v4099_v0, %s4231_s9  ;;  %4035 = vrot.lane.b32.xlu0 %v4034_v4, %s4227_s5  ;;  %v2136_v33 = vcombine.low %v6627_v45, %v2124_v6  ;;  %v2221_v27 = vcombine.high %v5737_v36, %v5740_v14  ;;  %v2253_v3 = vcombine.high %v5842_v51, %v5830_v38  ;;  %v5897_v32 = vpop.permute.xlu1 %3865  ;;  %v5910_v48 = vpop.permute.xlu0 %3860  ;;  %v4232_v49 = vmov 0.0  }
 0x19d   : > { %v4119_v55 = vpack.i.bf16 %v3174_v18, %v3038_v53  ;;  %v3171_v40 = vcombine.low %v3127_v31, %v3159_v17  ;;  %v3035_v25 = vcombine.low %v2991_v63, %v3023_v13  ;;  %v2273_v29 = vcombine.high %v2228_v61, %v2260_v58  ;;  %v6629_v61 = vld [vmem:[#allocation51_spill] sm:$0xff]  ;;  %1912 = vmatprep.mubr.f32.mxu1 %v4232_v49 }
 0x19e   : > { %v4054_v23 = vpack.i.bf16 %v2272_v8, %v2136_v33  ;;  %v2137_v2 = vcombine.high %v6627_v45, %v2124_v6  ;;  %v2235_v11 = vrot.slane %v2221_v27, %v4527_v12  ;;  %v2267_v50 = vrot.slane %v2253_v3, %v4527_v12  ;;  %1014 = vmatprep.mubr.f32.mxu0 %v4232_v49 }
 0x19f   : > { %v4064_v59 = vpack.i.bf16 %v3171_v40, %v3035_v25  ;;  %v3172_v22 = vcombine.high %v3127_v31, %v3159_v17  ;;  %v6628_v36 = vcombine.high %v6624_v57, %v6625_v16  ;;  %v3036_v38 = vcombine.high %v2991_v63, %v3023_v13  ;;  %v6633_v17 = vld [vmem:[#allocation45_spill] sm:$0xff] }
 0x1a0   : > { %4110 = vrot.lane.b32.xlu1 %v4109_v62, %s4231_s9  ;;  %4045 = vrot.lane.b32.xlu0 %v4044_v5, %s4227_s5  ;;  %v4074_v1 = vpack.i.bf16 %v2273_v29, %v2137_v2  ;;  %v3876_v51 = vpop.permute.xlu1 %3875  ;;  %v2274_v54 = vcombine.low %v2235_v11, %v2267_v50  ;;  %v3173_v37 = vcombine.low %v3134_v9, %v5860_v30  ;;  %v3848_v46 = vunpack.i.h.bf16 %v5888_v34  ;;  %v6630_v62 = vld [vmem:[#allocation47_spill] sm:$0xff]  ;;  %v6634_v5 = vld [vmem:[#allocation46_spill] sm:$0xff]  ;;  %s6189_s5 = scalar_lea.vmem [#allocation2], %s3754_s4 }
 0x1a1   : > { %v2131_v14 = vrot.slane %v6628_v36, %v4527_v12  ;;  %v4084_v19 = vpack.i.bf16 %v3172_v22, %v3036_v38  ;;  %v5917_v12 = vpop.permute.xlu0 %3870  ;;  %v3037_v58 = vcombine.low %v2998_v20, %v3030_v15  ;;  %v2275_v4 = vcombine.high %v2235_v11, %v2267_v50  ;;  %v6631_v20 = vld [vmem:[#allocation48_spill] sm:$0xff]  ;;  %v6636_v50 = vld [vmem:[#allocation31_spill] sm:$0xff] }
 0x1a2   : > { %v3847_v30 = vunpack.i.l.bf16 %v5888_v34  ;;  %v4233_v21 = vmov 0   ;;  %v3858_v57 = vunpack.i.h.bf16 %v5886_v7  ;;  %v3857_v15 = vunpack.i.l.bf16 %v5886_v7 }
 0x1a3   : > { %v2138_v10 = vcombine.low %v6629_v61, %v2131_v14  ;;  %v4104_v41 = vpack.i.bf16 %v3173_v37, %v3037_v58  ;;  %v2139_v9 = vcombine.high %v6629_v61, %v2131_v14  ;;  %4125 = vset.pattern.permute.xlu1 %v4233_v21  ;;  %4124 = vset.pattern.permute.xlu0 %v4233_v21  ;;  %v3868_v47 = vunpack.i.h.bf16 %v5897_v32  ;;  %v6639_v14 = vld [vmem:[#allocation62_spill] sm:$0xff] }
 0x1a4   : > { %4120 = vrot.lane.b32.xlu1 %v4119_v55, %s4231_s9  ;;  %4055 = vrot.lane.b32.xlu0 %v4054_v23, %s4228_s6  ;;  %v3886_v0 = vpop.permute.xlu1 %3885  ;;  %v3867_v6 = vunpack.i.l.bf16 %v5897_v32  ;;  %v6632_v18 = vcombine.low %v6630_v62, %v6631_v20  ;;  %v6635_v8 = vcombine.low %v6633_v17, %v6634_v5  ;;  %v3878_v13 = vunpack.i.h.bf16 %v3876_v51  ;;  %v6642_v20 = vld [vmem:[#allocation53_spill] sm:$0xff] }
 0x1a5   : > { %v4094_v42 = vpack.i.bf16 %v2274_v54, %v2138_v10  ;;  %v5931_v60 = vpop.permute.xlu0 %3880  ;;  %v4114_v44 = vpack.i.bf16 %v2275_v4, %v2139_v9  ;;  %v3877_v45 = vunpack.i.l.bf16 %v3876_v51  ;;  %v3888_v7 = vunpack.i.h.bf16 %v3886_v0 }
 0x1a6   : > { %v927_v26 = vsel %vm905_vm0, %v6632_v18, %v3848_v46  ;;  %v926_v53 = vsel %vm905_vm0, %v6635_v8, %v3847_v30  ;;  %v3887_v55 = vunpack.i.l.bf16 %v3886_v0  ;;  %v6640_v38 = vcombine.low %v6630_v62, %v6639_v14  ;;  %v6641_v62 = vld [vmem:[#allocation21_spill] sm:$0xff] }
 0x1a7   : > { %v928_v33 = vsel %vm908_vm1, %v926_v53, %v3857_v15  ;;  %v929_v31 = vsel %vm908_vm1, %v927_v26, %v3858_v57  ;;  %v2132_v18 = vcombine.low %v6642_v20, %v6641_v62 }
 0x1a8   : > { %4065 = vrot.lane.b32.xlu0 %v4064_v59, %s4228_s6  ;;  %v3901_v16 = vpop.permute.xlu1 %3900  ;;  %1842 = vperm.xlu1 %4125, %v1839_v28   ;;  %v930_v23 = vsel %vm911_vm2, %v928_v33, %v3867_v6  ;;  %v931_v63 = vsel %vm911_vm2, %v929_v31, %v3868_v47  ;;  %s3774_s6 = sshll.u32 %s4277_s16, 10  ;;  %s6210_s16 = scalar_lea.sflag [#allocation3], %s161_s29 }
 0x1a9   : > { %v3903_v3 = vunpack.i.h.bf16 %v3901_v16  ;;  %v3902_v59 = vunpack.i.l.bf16 %v3901_v16  ;;  %v932_v2 = vsel %vm914_vm3, %v930_v23, %v3877_v45  ;;  %v933_v11 = vsel %vm914_vm3, %v931_v63, %v3878_v13  ;;  %s6202_s10 = scalar_lea.hbm %s6255_s3, %s3774_s6 }
 0x1aa   : > { %v934_v54 = vsel %vm917_vm4, %v932_v2, %v3887_v55  ;;  %v935_v61 = vsel %vm917_vm4, %v933_v11, %v3888_v7  ;;  %v6643_v55 = vld [vmem:[#allocation74_spill] sm:$0xff] }
 0x1ab   : > { %v936_v58 = vsel %vm920_vm5, %v934_v54, %v3902_v59  ;;  %v6650_v2 = vld [vmem:[#allocation14_spill] sm:$0xff] }
 0x1ac   : > { %4075 = vrot.lane.b32.xlu0 %v4074_v1, %s4229_s7  ;;  %2693 = vperm.xlu1 %4125, %v1839_v28   ;;  %v6637_v1 = vld [vmem:[#allocation10_spill] sm:$0xff] }
 0x1ad   : > { %v6638_v22 = vcombine.low %v6636_v50, %v6637_v1 }
 0x1b0   : > { %4085 = vrot.lane.b32.xlu0 %v4084_v19, %s4229_s7  ;;  %s3688_s7 = sshll.u32 %s6189_s5, 4  ;;  %s6204_s7 = int_to_ptr.vmem [resolvable:$true] %s3688_s7 }
 0x1b1   : > { %s4158_s11 = scalar_lea.vmem %s6204_s7, 1024  ;;  %p4165_p0 = scmp.lt.s32.totalorder %s6204_s7, %s4163_s19 }
 0x1b2   : > { %p4159_p11 = scmp.ne.s32.totalorder %s6204_s7, %s4158_s11  ;;  %p4166_p1 = scmp.lt.s32.totalorder %s4164_s20, %s4158_s11 }
 0x1b4   : > { %4095 = vrot.lane.b32.xlu0 %v4094_v42, %s4230_s8  ;;  %p4160_p12 = pnand %p4159_p11, %p4294_p5  ;;  %p4167_p2 = por %p4166_p1, %p4165_p0 }
 0x1b6   : > { %p4161_p13 = pneg %p4160_p12 }
 0x1b8   : > { %4105 = vrot.lane.b32.xlu0 %v4104_v41, %s4230_s8  ;;  %v937_v41 = vsel %vm920_vm5, %v935_v61, %v3903_v3  ;;  %v6647_v3 = vld [vmem:[#allocation23_spill] sm:$0xff]  ;;  %p4168_p3 = pnand %p4167_p2, %p4161_p13 }
 0x1bc   : > { %4115 = vrot.lane.b32.xlu0 %v4114_v44, %s4231_s9 }
 0x1be   : > { %v3911_v34 = vpop.permute.xlu1 %3910  ;;  %v3891_v27 = vpop.permute.xlu0 %3890 }
 0x1bf   : > { %v3913_v40 = vunpack.i.h.bf16 %v3911_v34  ;;  %v3912_v25 = vunpack.i.l.bf16 %v3911_v34  ;;  %v3893_v29 = vunpack.i.h.bf16 %v3891_v27  ;;  %v3892_v32 = vunpack.i.l.bf16 %v3891_v27  ;;  %v6644_v34 = vld [vmem:[#allocation76_spill] sm:$0xff]  ;;  %v6646_v27 = vld [vmem:[#allocation17_spill] sm:$0xff] }
 0x1c0   : > { %944 = vperm.xlu0 %4124, %v1839_v28   ;;  %v6645_v23 = vcombine.low %v6643_v55, %v6644_v34  ;;  %v6648_v59 = vcombine.low %v6646_v27, %v6647_v3  ;;  %v3852_v55 = vunpack.i.l.bf16 %v5899_v35  ;;  %v3862_v3 = vunpack.i.l.bf16 %v5910_v48 }
 0x1c1   : > { %v2675_v36 = vsel %vm905_vm0, %v6638_v22, %v3893_v29  ;;  %v2674_v51 = vsel %vm905_vm0, %v6640_v38, %v3892_v32  ;;  %v6649_v32 = vld [vmem:[#allocation13_spill] sm:$0xff] }
 0x1c2   : > { %v3921_v19 = vpop.permute.xlu1 %3920  ;;  %v5959_v37 = vsel %vm908_vm1, %v2674_v51, %v3912_v25  ;;  %v5962_v0 = vsel %vm908_vm1, %v2675_v36, %v3913_v40  ;;  %v5970_v6 = vpop.permute.xlu0 %3895  ;;  %v6651_v11 = vcombine.low %v6649_v32, %v6650_v2 }
 0x1c3   : > { %v3923_v10 = vunpack.i.h.bf16 %v3921_v19  ;;  %v3922_v42 = vunpack.i.l.bf16 %v3921_v19 }
 0x1c4   : > { %3592 = vperm.xlu0 %4124, %v1839_v28  }
 0x1c5   : > { %v938_v4 = vsel %vm923_vm6, %v936_v58, %v3922_v42  ;;  %v939_v46 = vsel %vm923_vm6, %v937_v41, %v3923_v10 }
 0x1c6   : > { %v3926_v30 = vpop.permute.xlu1 %3925  ;;  %v3775_v9 = vpack.c.bf16 %v939_v46, %v938_v4 }
 0x1c7   : > { %v3928_v26 = vunpack.i.h.bf16 %v3926_v30  ;;  %v3927_v17 = vunpack.i.l.bf16 %v3926_v30 }
 0x1c8   : > { %3776 = vmatprep.subr.bf16.mxu0 %v3775_v9 }
 0x1c9   : > { %v1824_v29 = vsel %vm905_vm0, %v6648_v59, %v3928_v26  ;;  %v1823_v50 = vsel %vm905_vm0, %v6651_v11, %v3927_v17 }
 0x1ca   : > { %v3936_v21 = vpop.permute.xlu1 %3935 }
 0x1cb   : > { %v3938_v8 = vunpack.i.h.bf16 %v3936_v21  ;;  %v3937_v28 = vunpack.i.l.bf16 %v3936_v21 }
 0x1cd   : > { %v1825_v14 = vsel %vm908_vm1, %v1823_v50, %v3937_v28  ;;  %v1826_v38 = vsel %vm908_vm1, %v1824_v29, %v3938_v8 }
 0x1ce   : > { %v3946_v57 = vpop.permute.xlu1 %3945 }
 0x1cf   : > { %v3948_v45 = vunpack.i.h.bf16 %v3946_v57  ;;  %v3947_v33 = vunpack.i.l.bf16 %v3946_v57 }
 0x1d1   : > { %v1827_v54 = vsel %vm911_vm2, %v1825_v14, %v3947_v33  ;;  %v1828_v61 = vsel %vm911_vm2, %v1826_v38, %v3948_v45  ;;  %v6657_v38 = vld [vmem:[#allocation20_spill] sm:$0xff] }
 0x1d2   : > { %v3956_v15 = vpop.permute.xlu1 %3955 }
 0x1d3   : > { %v3958_v31 = vunpack.i.h.bf16 %v3956_v15  ;;  %v3957_v7 = vunpack.i.l.bf16 %v3956_v15 }
 0x1d5   : > { %v1829_v10 = vsel %vm914_vm3, %v1827_v54, %v3957_v7  ;;  %v1830_v42 = vsel %vm914_vm3, %v1828_v61, %v3958_v31  ;;  %v6652_v31 = vld [vmem:[#allocation54_spill] sm:$0xff] }
 0x1d6   : > { %v3966_v16 = vpop.permute.xlu1 %3965  ;;  %v513_v7 = vcombine.low %v6642_v20, %v6652_v31  ;;  %v3873_v31 = vunpack.i.h.bf16 %v5917_v12 }
 0x1d7   : > { %v3968_v1 = vunpack.i.h.bf16 %v3966_v16  ;;  %v3967_v22 = vunpack.i.l.bf16 %v3966_v16 }
 0x1d9   : > { %v1831_v30 = vsel %vm917_vm4, %v1829_v10, %v3967_v22  ;;  %v1832_v9 = vsel %vm917_vm4, %v1830_v42, %v3968_v1  ;;  %v6653_v1 = vld [vmem:[#allocation24_spill] sm:$0xff]  ;;  %v6654_v22 = vld [vmem:[#allocation6_spill] sm:$0xff]  ;;  %v6659_v10 = vld [vmem:[#allocation15_spill] sm:$0xff] }
 0x1da   : > { %v5968_v47 = vpop.permute.xlu1 %3970  ;;  %v6655_v14 = vcombine.low %v6653_v1, %v6654_v22  ;;  %v6660_v42 = vld [vmem:[#allocation16_spill] sm:$0xff] }
 0x1db   : > { %v3972_v1 = vunpack.i.l.bf16 %v5968_v47 }
 0x1de   : > { %v3981_v44 = vpop.permute.xlu1 %3980  ;;  %v3906_v5 = vpop.permute.xlu0 %3905 }
 0x1df   : > { %v3908_v53 = vunpack.i.h.bf16 %v3906_v5  ;;  %v3907_v13 = vunpack.i.l.bf16 %v3906_v5  ;;  %v3983_v51 = vunpack.i.h.bf16 %v3981_v44  ;;  %v3982_v19 = vunpack.i.l.bf16 %v3981_v44 }
 0x1e1   : > { %v5978_v63 = vsel %vm905_vm0, %v6645_v23, %v3908_v53  ;;  %v5981_v40 = vsel %vm905_vm0, %v2132_v18, %v3907_v13  ;;  %v1833_v21 = vsel %vm920_vm5, %v1831_v30, %v3982_v19  ;;  %v1834_v57 = vsel %vm920_vm5, %v1832_v9, %v3983_v51 }
 0x1e2   : > { %v5983_v25 = vpop.permute.xlu1 %3990  ;;  %v5993_v36 = vpop.permute.xlu0 %3915  ;;  %v3853_v13 = vunpack.i.h.bf16 %v5899_v35  ;;  %v6656_v35 = vld [vmem:[#allocation22_spill] sm:$0xff] }
 0x1e3   : > { %v6658_v51 = vcombine.low %v6656_v35, %v6657_v38  ;;  %v3992_v35 = vunpack.i.l.bf16 %v5983_v25 }
 0x1e4   : > { %v907_v2 = vsel %vm905_vm0, %v513_v7, %v3853_v13  ;;  %v3883_v7 = vunpack.i.h.bf16 %v5931_v60 }
 0x1e6   : > { %v4001_v58 = vpop.permute.xlu1 %4000  ;;  %v3931_v46 = vpop.permute.xlu0 %3930 }
 0x1e7   : > { %v4003_v41 = vunpack.i.h.bf16 %v4001_v58  ;;  %v4002_v4 = vunpack.i.l.bf16 %v4001_v58  ;;  %v3933_v45 = vunpack.i.h.bf16 %v3931_v46  ;;  %v3932_v33 = vunpack.i.l.bf16 %v3931_v46 }
 0x1e8   : > { %v6661_v58 = vcombine.low %v6659_v10, %v6660_v42 }
 0x1e9   : > { %v1835_v15 = vsel %vm923_vm6, %v1833_v21, %v4002_v4  ;;  %v1836_v16 = vsel %vm923_vm6, %v1834_v57, %v4003_v41  ;;  %v1810_v20 = vsel %vm905_vm0, %v6655_v14, %v3933_v45  ;;  %v1809_v19 = vsel %vm905_vm0, %v6658_v51, %v3932_v33 }
 0x1ea   : > { %v6007_v44 = vpop.permute.xlu1 %4010  ;;  %v3779_v62 = vpack.c.bf16 %v1836_v16, %v1835_v15  ;;  %v3941_v18 = vpop.permute.xlu0 %3940  ;;  %v906_v41 = vsel %vm905_vm0, %v6661_v58, %v3852_v55  ;;  %v3863_v4 = vunpack.i.h.bf16 %v5910_v48  ;;  %v3872_v57 = vunpack.i.l.bf16 %v5917_v12 }
 0x1eb   : > { %v3943_v34 = vunpack.i.h.bf16 %v3941_v18  ;;  %v3942_v23 = vunpack.i.l.bf16 %v3941_v18  ;;  %v909_v21 = vsel %vm908_vm1, %v906_v41, %v3862_v3  ;;  %v3882_v3 = vunpack.i.l.bf16 %v5931_v60  ;;  %v6662_v41 = vld [vmem:[#allocation67_spill] sm:$0xff] }
 0x1ec   : > { %3780 = vmatprep.subr.bf16.mxu1 %v3779_v62  ;;  %v3897_v12 = vunpack.i.l.bf16 %v5970_v6  ;;  %v910_v14 = vsel %vm908_vm1, %v907_v2, %v3863_v4  ;;  %v3993_v60 = vunpack.i.h.bf16 %v5983_v25  ;;  %v3918_v51 = vunpack.i.h.bf16 %v5993_v36  ;;  %v6663_v4 = vld [vmem:[#allocation68_spill] sm:$0xff] }
 0x1ed   : > { %v1811_v46 = vsel %vm908_vm1, %v1809_v19, %v3942_v23  ;;  %v1812_v30 = vsel %vm908_vm1, %v1810_v20, %v3943_v34  ;;  %v912_v20 = vsel %vm911_vm2, %v909_v21, %v3872_v57  ;;  %v913_v38 = vsel %vm911_vm2, %v910_v14, %v3873_v31  ;;  %v6665_v21 = vld [vmem:[#allocation52_spill] sm:$0xff] }
 0x1ee   : > { %v6009_v26 = vpop.permute.xlu1 %4020  ;;  %v3951_v17 = vpop.permute.xlu0 %3950  ;;  %v3917_v19 = vunpack.i.l.bf16 %v5993_v36  ;;  %v915_v2 = vsel %vm914_vm3, %v912_v20, %v3882_v3  ;;  %v4013_v25 = vunpack.i.h.bf16 %v6007_v44  ;;  %v6666_v57 = vld [vmem:[#allocation56_spill] sm:$0xff] }
 0x1ef   : > { %v3953_v59 = vunpack.i.h.bf16 %v3951_v17  ;;  %v3952_v29 = vunpack.i.l.bf16 %v3951_v17  ;;  %v918_v36 = vsel %vm917_vm4, %v915_v2, %v3897_v12  ;;  %v4022_v31 = vunpack.i.l.bf16 %v6009_v26 }
 0x1f1   : > { %v1813_v15 = vsel %vm911_vm2, %v1811_v46, %v3952_v29  ;;  %v1814_v16 = vsel %vm911_vm2, %v1812_v30, %v3953_v59  ;;  %v3898_v59 = vunpack.i.h.bf16 %v5970_v6  ;;  %v4012_v6 = vunpack.i.l.bf16 %v6007_v44 }
 0x1f2   : > { %v4031_v5 = vpop.permute.xlu1 %4030  ;;  %v3961_v8 = vpop.permute.xlu0 %3960  ;;  %v6664_v46 = vcombine.low %v6662_v41, %v6663_v4 }
 0x1f3   : > { %v3963_v11 = vunpack.i.h.bf16 %v3961_v8  ;;  %v3962_v50 = vunpack.i.l.bf16 %v3961_v8  ;;  %v4032_v13 = vunpack.i.l.bf16 %v4031_v5 }
 0x1f4   : > { %v3573_v30 = vsel %vm905_vm0, %v6664_v46, %v3972_v1 }
 0x1f5   : > { %v1815_v18 = vsel %vm914_vm3, %v1813_v15, %v3962_v50  ;;  %v1816_v17 = vsel %vm914_vm3, %v1814_v16, %v3963_v11  ;;  %v3973_v50 = vunpack.i.h.bf16 %v5968_v47  ;;  %v3757_v47 = vld [vmem:[%s6253_s1 + $0x8] sm:$0xff]  ;;  %v6667_v15 = vcombine.low %v6665_v21, %v6666_v57 }
 0x1f6   : > { %v6011_v28 = vpop.permute.xlu1 %4040  ;;  %v3976_v53 = vpop.permute.xlu0 %3975  ;;  %v3575_v44 = vsel %vm908_vm1, %v3573_v30, %v3992_v35 }
 0x1f7   : > { %v3978_v54 = vunpack.i.h.bf16 %v3976_v53  ;;  %v3977_v61 = vunpack.i.l.bf16 %v3976_v53  ;;  %v4033_v53 = vunpack.i.h.bf16 %v4031_v5  ;;  %v4042_v10 = vunpack.i.l.bf16 %v6011_v28 }
 0x1f8   : > { %v3574_v16 = vsel %vm905_vm0, %v6667_v15, %v3973_v50 }
 0x1f9   : > { %v1817_v45 = vsel %vm917_vm4, %v1815_v18, %v3977_v61  ;;  %v1818_v33 = vsel %vm917_vm4, %v1816_v17, %v3978_v54  ;;  %v916_v61 = vsel %vm914_vm3, %v913_v38, %v3883_v7  ;;  %v4043_v18 = vunpack.i.h.bf16 %v6011_v28 }
 0x1fa   : > { %v6017_v27 = vpop.permute.xlu1 %4050  ;;  %v6020_v32 = vpop.permute.xlu0 %3985  ;;  %v919_v58 = vsel %vm917_vm4, %v916_v61, %v3898_v59  ;;  %v4023_v28 = vunpack.i.h.bf16 %v6009_v26  ;;  %v940_v61 = vld [vmem:[%s6253_s1] sm:$0xff] }
 0x1fe   : > { %v6038_v9 = vpop.permute.xlu1 %4060  ;;  %v3996_v62 = vpop.permute.xlu0 %3995 }
 0x1ff   : > { %v3998_v48 = vunpack.i.h.bf16 %v3996_v62  ;;  %v3997_v8 = vunpack.i.l.bf16 %v3996_v62  ;;  %v3576_v62 = vsel %vm908_vm1, %v3574_v16, %v3993_v60  ;;  %v4062_v17 = vunpack.i.l.bf16 %v6038_v9 }
 0x201   : > { %v1819_v34 = vsel %vm920_vm5, %v1817_v45, %v3997_v8  ;;  %v1820_v23 = vsel %vm920_vm5, %v1818_v33, %v3998_v48  ;;  %v2678_v48 = vsel %vm911_vm2, %v5959_v37, %v4012_v6  ;;  %v4063_v8 = vunpack.i.h.bf16 %v6038_v9 }
 0x202   : > { %v6050_v55 = vpop.permute.xlu1 %4070  ;;  %v6056_v29 = vpop.permute.xlu0 %4005  ;;  %v1821_v5 = vsel %vm923_vm6, %v1819_v34, %v4032_v13  ;;  %v1822_v11 = vsel %vm923_vm6, %v1820_v23, %v4033_v53  ;;  %v921_v13 = vsel %vm920_vm5, %v918_v36, %v3917_v19  ;;  %v922_v45 = vsel %vm920_vm5, %v919_v58, %v3918_v51 }
 0x203   : > { %v3781_v22 = vpack.c.bf16 %v1822_v11, %v1821_v5  ;;  %v2679_v33 = vsel %vm911_vm2, %v5962_v0, %v4013_v25  ;;  %v2680_v7 = vsel %vm914_vm3, %v2678_v48, %v4042_v10  ;;  %v4053_v5 = vunpack.i.h.bf16 %v6017_v27 }
 0x204   : > { %v2681_v59 = vsel %vm914_vm3, %v2679_v33, %v4043_v18  ;;  %v4052_v11 = vunpack.i.l.bf16 %v6017_v27  ;;  %v2682_v12 = vsel %vm917_vm4, %v2680_v7, %v4062_v17  ;;  %v4073_v50 = vunpack.i.h.bf16 %v6050_v55 }
 0x205   : > { %3782 = vmatpush1.bf16.msra.mxu1 %v3781_v22  ;;  %v2683_v0 = vsel %vm917_vm4, %v2681_v59, %v4063_v8  ;;  %v4072_v14 = vunpack.i.l.bf16 %v6050_v55  ;;  %v3988_v8 = vunpack.i.h.bf16 %v6020_v32  ;;  %v4008_v33 = vunpack.i.h.bf16 %v6056_v29 }
 0x206   : > { %v4081_v54 = vpop.permute.xlu1 %4080  ;;  %v6078_v42 = vpop.permute.xlu0 %4015 }
 0x207   : > { %v4083_v37 = vunpack.i.h.bf16 %v4081_v54  ;;  %v4082_v23 = vunpack.i.l.bf16 %v4081_v54  ;;  %v3577_v54 = vsel %vm911_vm2, %v3575_v44, %v4022_v31  ;;  %v4017_v31 = vunpack.i.l.bf16 %v6078_v42 }
 0x208   : > { %3758 = vmatmul.mubr.msk.f32.vlgmr.msra.gmra.mrb[0].mxu1 %vm905_vm0, %v3757_v47  ;;  %v3578_v47 = vsel %vm911_vm2, %v3576_v62, %v4023_v28  ;;  %v3579_v25 = vsel %vm914_vm3, %v3577_v54, %v4052_v11  ;;  %v4018_v28 = vunpack.i.h.bf16 %v6078_v42  ;;  %v2663_v59 = vsel %vm908_vm1, %v5978_v63, %v4008_v33 }
 0x209   : > { %3662 = vmatprep.mubr.f32.mxu1 %v4232_v49  ;;  %v2684_v27 = vsel %vm920_vm5, %v2682_v12, %v4082_v23  ;;  %v2685_v51 = vsel %vm920_vm5, %v2683_v0, %v4083_v37  ;;  %v3580_v10 = vsel %vm914_vm3, %v3578_v47, %v4053_v5  ;;  %v3581_v41 = vsel %vm917_vm4, %v3579_v25, %v4072_v14 }
 0x20a   : > { %v4091_v53 = vpop.permute.xlu1 %4090  ;;  %v4026_v34 = vpop.permute.xlu0 %4025  ;;  %v3582_v4 = vsel %vm917_vm4, %v3580_v10, %v4073_v50  ;;  %v3560_v37 = vsel %vm905_vm0, %v3167_v43, %v3988_v8 }
 0x20b   : > { %v4028_v9 = vunpack.i.h.bf16 %v4026_v34  ;;  %v4027_v3 = vunpack.i.l.bf16 %v4026_v34  ;;  %v4093_v19 = vunpack.i.h.bf16 %v4091_v53  ;;  %v4092_v6 = vunpack.i.l.bf16 %v4091_v53 }
 0x20c   : > { %v3987_v53 = vunpack.i.l.bf16 %v6020_v32  ;;  %v6668_v32 = vcombine.low %v5558_v39, %v5561_v56  ;;  %v3562_v52 = vsel %vm908_vm1, %v3560_v37, %v4018_v28 }
 0x20d   : > { %v924_v1 = vsel %vm923_vm6, %v921_v13, %v4027_v3  ;;  %v925_v22 = vsel %vm923_vm6, %v922_v45, %v4028_v9  ;;  %v3583_v57 = vsel %vm920_vm5, %v3581_v41, %v4092_v6  ;;  %v3584_v15 = vsel %vm920_vm5, %v3582_v4, %v4093_v19 }
 0x20e   : > { %v4101_v26 = vpop.permute.xlu1 %4100  ;;  %v6115_v35 = vpop.permute.xlu0 %4035  ;;  %v3777_v38 = vpack.c.bf16 %v925_v22, %v924_v1  ;;  %v4007_v13 = vunpack.i.l.bf16 %v6056_v29  ;;  %v3559_v23 = vsel %vm905_vm0, %v6668_v32, %v3987_v53 }
 0x20f   : > { %v4103_v20 = vunpack.i.h.bf16 %v4101_v26  ;;  %v4102_v60 = vunpack.i.l.bf16 %v4101_v26  ;;  %v3561_v5 = vsel %vm908_vm1, %v3559_v23, %v4017_v31  ;;  %v4038_v43 = vunpack.i.h.bf16 %v6115_v35 }
 0x210   : > { %3778 = vmatpush1.bf16.msra.mxu0 %v3777_v38  ;;  %v2662_v29 = vsel %vm908_vm1, %v5981_v40, %v4007_v13 }
 0x211   : > { %v2686_v2 = vsel %vm923_vm6, %v2684_v27, %v4102_v60  ;;  %v2687_v55 = vsel %vm923_vm6, %v2685_v51, %v4103_v20  ;;  %v2665_v54 = vsel %vm911_vm2, %v2663_v59, %v4038_v43 }
 0x212   : > { %v4111_v36 = vpop.permute.xlu1 %4110  ;;  %v3783_v58 = vpack.c.bf16 %v2687_v55, %v2686_v2  ;;  %v4046_v21 = vpop.permute.xlu0 %4045 }
 0x213   : > { %v4113_v46 = vunpack.i.h.bf16 %v4111_v36  ;;  %v4112_v30 = vunpack.i.l.bf16 %v4111_v36  ;;  %3756 = vmatmul.mubr.msk.f32.vlgmr.msra.gmra.mrb[0].mxu0 %vm905_vm0, %v940_v61  ;;  %v4048_v7 = vunpack.i.h.bf16 %v4046_v21  ;;  %v4047_v34 = vunpack.i.l.bf16 %v4046_v21 }
 0x214   : > { %3784 = vmatprep.subr.bf16.mxu0 %v3783_v58  ;;  %2763 = vmatprep.mubr.f32.mxu0 %v4232_v49  ;;  %v4037_v49 = vunpack.i.l.bf16 %v6115_v35 }
 0x215   : > { %v3585_v16 = vsel %vm923_vm6, %v3583_v57, %v4112_v30  ;;  %v3586_v44 = vsel %vm923_vm6, %v3584_v15, %v4113_v46  ;;  %v3563_v12 = vsel %vm911_vm2, %v3561_v5, %v4047_v34  ;;  %v3564_v40 = vsel %vm911_vm2, %v3562_v52, %v4048_v7 }
 0x216   : > { %v3787_v62 = vpack.c.bf16 %v3586_v44, %v3585_v16  ;;  %v4056_v18 = vpop.permute.xlu0 %4055  ;;  %v4121_v9 = vpop.permute.xlu1 %4120  ;;  %v2664_v39 = vsel %vm911_vm2, %v2662_v29, %v4037_v49  ;;  %v3765_v44 = vld [vmem:[%s6253_s1 + $0x18] sm:$0xff] }
 0x217   : > { %v4123_v0 = vunpack.i.h.bf16 %v4121_v9  ;;  %v4057_v50 = vunpack.i.l.bf16 %v4056_v18  ;;  %v4122_v26 = vunpack.i.l.bf16 %v4121_v9  ;;  %v4058_v1 = vunpack.i.h.bf16 %v4056_v18  ;;  %v3761_v18 = vld [vmem:[%s6253_s1 + $0x10] sm:$0xff] }
 0x218   : > { %3788 = vmatprep.subr.bf16.mxu1 %v3787_v62 }
 0x219   : > { %v2666_v47 = vsel %vm914_vm3, %v2664_v39, %v4057_v50  ;;  %v2667_v61 = vsel %vm914_vm3, %v2665_v54, %v4058_v1 }
 0x21a   : > { %v4066_v17 = vpop.permute.xlu0 %4065 }
 0x21b   : > { %v4067_v3 = vunpack.i.l.bf16 %v4066_v17  ;;  %v4068_v24 = vunpack.i.h.bf16 %v4066_v17 }
 0x21d   : > { %v3565_v63 = vsel %vm914_vm3, %v3563_v12, %v4067_v3  ;;  %v3566_v20 = vsel %vm914_vm3, %v3564_v40, %v4068_v24 }
 0x21e   : > { %v4076_v48 = vpop.permute.xlu0 %4075 }
 0x21f   : > { %v4077_v22 = vunpack.i.l.bf16 %v4076_v48  ;;  %v4078_v60 = vunpack.i.h.bf16 %v4076_v48 }
 0x221   : > { %v2668_v25 = vsel %vm917_vm4, %v2666_v47, %v4077_v22  ;;  %v2669_v41 = vsel %vm917_vm4, %v2667_v61, %v4078_v60 }
 0x222   : > { %v4086_v45 = vpop.permute.xlu0 %4085 }
 0x223   : > { %v4088_v56 = vunpack.i.h.bf16 %v4086_v45  ;;  %v4087_v11 = vunpack.i.l.bf16 %v4086_v45 }
 0x225   : > { %v3567_v27 = vsel %vm917_vm4, %v3565_v63, %v4087_v11  ;;  %v3568_v51 = vsel %vm917_vm4, %v3566_v20, %v4088_v56 }
 0x226   : > { %v4096_v42 = vpop.permute.xlu0 %4095 }
 0x227   : > { %v4098_v19 = vunpack.i.h.bf16 %v4096_v42  ;;  %v4097_v6 = vunpack.i.l.bf16 %v4096_v42  ;;  %v1843_v17 = vpop.permute.xlu1 %1842 }
 0x229   : > { %v2670_v21 = vsel %vm920_vm5, %v2668_v25, %v4097_v6  ;;  %v2671_v57 = vsel %vm920_vm5, %v2669_v41, %v4098_v19 }
 0x22a   : > { %v4106_v14 = vpop.permute.xlu0 %4105 }
 0x22b   : > { %v4108_v35 = vunpack.i.h.bf16 %v4106_v14  ;;  %v4107_v38 = vunpack.i.l.bf16 %v4106_v14  ;;  %v2694_v59 = vpop.permute.xlu1 %2693 }
 0x22d   : > { %v3569_v2 = vsel %vm920_vm5, %v3567_v27, %v4107_v38  ;;  %v3570_v55 = vsel %vm920_vm5, %v3568_v51, %v4108_v35 }
 0x22e   : > { %v4116_v10 = vpop.permute.xlu0 %4115  ;;  %v3571_v36 = vsel %vm923_vm6, %v3569_v2, %v4122_v26  ;;  %v3572_v58 = vsel %vm923_vm6, %v3570_v55, %v4123_v0 }
 0x22f   : > { %v4118_v4 = vunpack.i.h.bf16 %v4116_v10  ;;  %v4117_v46 = vunpack.i.l.bf16 %v4116_v10  ;;  %v3789_v30 = vpack.c.bf16 %v3572_v58, %v3571_v36 }
 0x231   : > { %v2672_v15 = vsel %vm923_vm6, %v2670_v21, %v4117_v46  ;;  %v2673_v16 = vsel %vm923_vm6, %v2671_v57, %v4118_v4  ;;  %3790 = vmatpush1.bf16.msra.mxu1 %v3789_v30 }
 0x232   : > { %v3785_v62 = vpack.c.bf16 %v2673_v16, %v2672_v15 }
 0x234   : > { %3786 = vmatpush1.bf16.msra.mxu0 %v3785_v62  ;;  %3766 = vmatmul.mubr.msk.f32.vlgmr.msra.gmra.mrb[2].mxu1 %vm905_vm0, %v3765_v44 }
 0x237   : > { %3762 = vmatmul.mubr.msk.f32.vlgmr.msra.gmra.mrb[2].mxu0 %vm905_vm0, %v3761_v18 }
 0x23f   : > { %v945_v28 = vpop.permute.xlu0 %944 }
 0x243   : > { %v3593_v23 = vpop.permute.xlu0 %3592 }
 0x2db   : > { %v1914_v48 = vpop.f32.mrb[0].mxu1 }
 0x2dc   : > { %v1915_v8 = vadd.f32 %v1914_v48, %v1843_v17  ;;  %v1916_v53 = vpop.f32.mrb[1].mxu1 }
 0x2dd   : > { %v1917_v13 = vadd.f32 %v1916_v53, %v1843_v17 }
 0x2de   : > { %v1919_v45 = vmax.f32 %v1915_v8, 0.0 }
 0x2df   : > { %v1920_v33 = vmax.f32 %v1917_v13, 0.0 }
 0x2e0   : > { %3759 = vst [vmem:[%s6189_s5 + $0x10] sm:$0xff] %v1919_v45 }
 0x2e1   : > { %3760 = vst [vmem:[%s6189_s5 + $0x18] sm:$0xff] %v1920_v33 }
 0x2e6   : > { %v1016_v31 = vpop.f32.mrb[0].mxu0 }
 0x2e7   : > { %v1017_v49 = vadd.f32 %v1016_v31, %v945_v28  ;;  %v1018_v7 = vpop.f32.mrb[1].mxu0 }
 0x2e8   : > { %v1019_v34 = vadd.f32 %v1018_v7, %v945_v28 }
 0x2e9   : > { %v1021_v37 = vmax.f32 %v1017_v49, 0.0 }
 0x2ea   : > { %v1022_v32 = vmax.f32 %v1019_v34, 0.0 }
 0x2eb   : > { %1023 = vst [vmem:[%s6189_s5] sm:$0xff] %v1021_v37 }
 0x2ec   : > { %1024 = vst [vmem:[%s6189_s5 + $0x8] sm:$0xff] %v1022_v32 }
 0x307   : > { %v3664_v29 = vpop.f32.mrb[2].mxu1 }
 0x308   : > { %v3665_v9 = vadd.f32 %v3664_v29, %v3593_v23  ;;  %v3666_v3 = vpop.f32.mrb[3].mxu1 }
 0x309   : > { %v3667_v42 = vadd.f32 %v3666_v3, %v3593_v23 }
 0x30a   : > { %v3669_v5 = vmax.f32 %v3665_v9, 0.0  ;;  %v2765_v52 = vpop.f32.mrb[2].mxu0 }
 0x30b   : > { %v3670_v24 = vmax.f32 %v3667_v42, 0.0  ;;  %v2766_v43 = vadd.f32 %v2765_v52, %v2694_v59  ;;  %v2767_v39 = vpop.f32.mrb[3].mxu0 }
 0x30c   : > { %3767 = vst [vmem:[%s6189_s5 + $0x30] sm:$0xff] %v3669_v5  ;;  %v2768_v56 = vadd.f32 %v2767_v39, %v2694_v59 }
 0x30d   : > { %3768 = vst [vmem:[%s6189_s5 + $0x38] sm:$0xff] %v3670_v24  ;;  %v2770_v11 = vmax.f32 %v2766_v43, 0.0 }
 0x30e   : > { %v2771_v12 = vmax.f32 %v2768_v56, 0.0 }
 0x30f   : > { %3763 = vst [vmem:[%s6189_s5 + $0x20] sm:$0xff] %v2770_v11 }
 0x310   : > { %3764 = vst [vmem:[%s6189_s5 + $0x28] sm:$0xff] %v2771_v12 }
 0x311   : > { %4171 = shalt.err (!%p4168_p3)
}
 0x312   : > { %s4172_s24 = scalar_lea.hbm %s6202_s10, 1024  ;;  %s4176_s27 = scalar_lea.hbm %s6255_s3, 2048 }
 0x313   : > { %p4173_p4 = scmp.ne.s32.totalorder %s6202_s10, %s4172_s24  ;;  %p4177_p9 = scmp.lt.u32.totalorder %s6202_s10, %s6255_s3 }
 0x314   : > { %p4178_p10 = scmp.lt.u32.totalorder %s4176_s27, %s4172_s24  ;;  %p4180_p12 = scmp.lt.u32.totalorder %s4172_s24, %s6202_s10 }
 0x315   : > { %p4174_p7 = pnand %p4173_p4, %p4294_p5 }
 0x316   : > { %p4179_p11 = por %p4178_p10, %p4177_p9 }
 0x317   : > { %p4175_p8 = pneg %p4174_p7 }
 0x318   : > { %p4181_p13 = por %p4180_p12, %p4179_p11 }
 0x31a   : > { %p4182_p0 = pnand %p4181_p13, %p4175_p8 }
 0x31c   : > { %4185 = shalt.err (!%p4182_p0)
}
 0x31d   : > { %s4235_s4 = smov 256  }
 0x31e   : > { %3792 = dma.vmem_to_hbm [thread:$0]  (%p4294_p5), %s6204_s7, 1024, %s6202_s10, %s6210_s16, %s4235_s4, %s4235_s4, %s4225_s30  }
 0x31f PF: > { %p3798_p1 = scmp.ge.s32.totalorder %s4220_s15, 2  ;;  %s3703_s5 = sand.u32 1, %s4208_s12  }
 0x320   : > { %s3704_s6 = scalar_lea.sflag [#allocation3], %s3703_s5 }
 0x321   : > { %p3795_p2 = pnand %p3798_p1, %p4298_p6 }
 0x323   : > { %4203 = dma.done.wait (!%p3795_p2), %s3704_s6, 1024  }
 0x324   : > { %4205 = vsyncadd (!%p3795_p2), %s3704_s6, 4294966272  ;;  %p13_p3 = scmp.ge.s32.totalorder %s4281_s18, 4   ;;  %s6669_s12 = smov %s4212_s13 }
 0x325   : > { %s6670_s13 = smov %s4216_s14  ;;  %s6671_s14 = smov %s4292_s21 }
 0x326   : > { %s6672_s15 = smov %s4281_s18  ;;  %15 = sbr.rel (!%p13_p3) target bundleno = 3 (0x3), region = 73 }
 0x32d   :  { %3709 = vsyncpa [#allocation3], 1 }
 0x32e   :  { %3711 = vsyncpa [#allocation3 + $0x1], 1 }

</bundles_post_ra>
